<compile_context>
chip_gen: v7x
topology: tpu7x:2x2x1
jax: 0.10.0
libtpu: 0.0.40
codegen_flags: <defaults>
</compile_context>

<pallas_src>
import functools

import jax
import jax.numpy as jnp
from jax.experimental import pallas as pl
from jax.experimental.pallas import tpu as pltpu

BN_EPS = 1e-5


def _round_up(x, m):
    return (x + m - 1) // m * m


def _vmem_budget_bytes():
    """Usable per-core VMEM budget with headroom for compiler scratch."""
    try:
        cap = pltpu.get_tpu_info().vmem_capacity_bytes
    except Exception:
        cap = 64 * 1024 * 1024        # conservative: v7x per-core VMEM
    return int(cap * 0.75)            # 48 MiB on v7x, 96 MiB on v5e/v6e


def _pick_gap_tiles(B, C, HW, itemsize, budget):
    """Pick (c_tile, hw_tile) so the double-buffered streamed x block fits VMEM."""
    x_budget = max(budget - (2 << 20), 1 << 20)   # reserve for outputs / misc
    if C % 128 == 0:
        # lane-dense pooled output => C tile must be a multiple of 128 (or full C)
        c_cands = [t for t in (1024, 512, 256, 128) if t <= C and C % t == 0] or [C]
    else:
        c_cands = [C]
    for tc in c_cands:
        hw_max = x_budget // (2 * B * tc * itemsize)   # 2 = double buffering
        if HW <= hw_max:
            return tc, HW                               # single spatial tile, no mask
        thw = min((hw_max // 128) * 128, 2048)          # lane-aligned streamed tile
        if thw >= 128:
            return tc, thw
    return c_cands[-1], (HW if HW < 128 else 128)


# --------------------------- stage 1: global avg pool ---------------------------

def _gap_kernel(x_ref, gf_ref, *, hw_total, hw_tile, needs_mask, inv_hw):
    # x_ref : [B, tc, thw]  tile of the NCHW feature map viewed as [B, C, HW]
    #                        (HW on lanes, C on sublanes -> no wrapper transpose)
    # gf_ref: [B, tc] f32    pooled-mean output slice; accumulated in place.
    si = pl.program_id(1)

    @pl.when(si == 0)
    def _():
        gf_ref[...] = jnp.zeros_like(gf_ref)

    if needs_mask:
        last = pl.num_programs(1) - 1

        @pl.when(si < last)
        def _():
            gf_ref[...] += jnp.sum(x_ref[...].astype(jnp.float32), axis=-1)

        @pl.when(si == last)
        def _():
            xt = x_ref[...]
            lane = jax.lax.broadcasted_iota(jnp.int32, xt.shape, 2)
            xt = jnp.where(si * hw_tile + lane < hw_total, xt, jnp.zeros_like(xt))
            gf_ref[...] += jnp.sum(xt.astype(jnp.float32), axis=-1)
    else:
        gf_ref[...] += jnp.sum(x_ref[...].astype(jnp.float32), axis=-1)

    @pl.when(si == pl.num_programs(1) - 1)
    def _():
        gf_ref[...] *= inv_hw


# ---------------------- stage 2: BN bottleneck + classifier ---------------------

def _bn_classifier_kernel(gf_ref, w_ref, gamma_ref, beta_ref, cls_ref):
    # gf_ref    : [B, C]  f32  pooled features (grid-invariant block)
    # w_ref     : [C, tn]      classifier weight tile (pre-transposed, lane-dense in N)
    # gamma/beta: [1, C]  f32  BatchNorm1d affine parameters
    # cls_ref   : [B, tn] f32  classifier logits tile
    gf = gf_ref[...]
    # training-mode BatchNorm1d: biased batch statistics over the batch dim.
    # (recomputed per N tile -- trivially cheap -- so the N axis stays "parallel")
    mu = jnp.mean(gf, axis=0, keepdims=True)
    centered = gf - mu
    var = jnp.mean(centered * centered, axis=0, keepdims=True)
    feat = centered * jax.lax.rsqrt(var + BN_EPS)
    feat = feat * gamma_ref[...] + beta_ref[...]

    w = w_ref[...]
    cls_ref[...] = jnp.dot(feat.astype(w.dtype), w,
                           preferred_element_type=jnp.float32).astype(cls_ref.dtype)


# ------------------------------------ wrapper -----------------------------------

def backbone_head(x_nchw, classifier_weight, bn_gamma, bn_beta, *,
                  classifier_mxu_dtype=None, c_tile=None, hw_tile=None):
    """Backbone head (training path, bnneck).

    x_nchw           : [B, C, H, W] backbone feature map (f32 or bf16)
    classifier_weight: [num_classes, C] (PyTorch nn.Linear convention)
    bn_gamma/bn_beta : [C] BatchNorm1d affine parameters
    Returns (cls_score [B, num_classes] f32, global_feat [B, C] f32).
    """
    B, C, H, W = x_nchw.shape
    N = classifier_weight.shape[0]
    HW = H * W

    budget = _vmem_budget_bytes()
    itemsize = jnp.dtype(x_nchw.dtype).itemsize
    tc_auto, thw_auto = _pick_gap_tiles(B, C, HW, itemsize, budget)
    tc = c_tile if c_tile is not None else tc_auto
    thw = hw_tile if hw_tile is not None else thw_auto
    thw = min(thw, HW)
    if thw < HW:
        thw = max((thw // 128) * 128, 128)   # block last dim: 128-aligned unless full
    assert C % tc == 0, "c_tile must divide C"
    n_c = C // tc
    n_hw = pl.cdiv(HW, thw)

    # ---- stage 1: stream the NCHW feature map (free reshape, no transpose/pad) ----
    x_flat = x_nchw.reshape(B, C, HW)

    gap_kernel = functools.partial(
        _gap_kernel, hw_total=HW, hw_tile=thw,
        needs_mask=(HW % thw != 0), inv_hw=1.0 / HW)

    global_feat = pl.pallas_call(
        gap_kernel,
        out_shape=jax.ShapeDtypeStruct((B, C), jnp.float32),
        grid_spec=pltpu.PrefetchScalarGridSpec(
            num_scalar_prefetch=0,
            grid=(n_c, n_hw),
            in_specs=[pl.BlockSpec((B, tc, thw), lambda ci, si: (0, ci, si))],
            out_specs=pl.BlockSpec((B, tc), lambda ci, si: (0, ci)),
        ),
        compiler_params=pltpu.CompilerParams(
            dimension_semantics=("parallel", "arbitrary"),  # C tiles parallel, HW reduce
            vmem_limit_bytes=budget,
        ),
    )(x_flat)

    # ---- stage 2: BN bottleneck + classifier (tiny; tiled over num_classes) ----
    mxu_dtype = classifier_mxu_dtype if classifier_mxu_dtype is not None \
        else classifier_weight.dtype
    N_pad = _round_up(N, 128)
    w_itemsize = jnp.dtype(mxu_dtype).itemsize
    tn = next((t for t in (512, 256, 128)
               if N_pad % t == 0 and 2 * C * t * w_itemsize <= budget // 2), 128)
    # one-time wrapper-side relayout: [N, C] -> lane-dense [C, N_pad]
    w_t = jnp.pad(classifier_weight.astype(mxu_dtype).T, ((0, 0), (0, N_pad - N)))
    gamma = bn_gamma.astype(jnp.float32).reshape(1, C)
    beta = bn_beta.astype(jnp.float32).reshape(1, C)

    cls_pad = pl.pallas_call(
        _bn_classifier_kernel,
        out_shape=jax.ShapeDtypeStruct((B, N_pad), jnp.float32),
        grid_spec=pltpu.PrefetchScalarGridSpec(
            num_scalar_prefetch=0,
            grid=(N_pad // tn,),
            in_specs=[
                pl.BlockSpec((B, C), lambda j: (0, 0)),
                pl.BlockSpec((C, tn), lambda j: (0, j)),
                pl.BlockSpec((1, C), lambda j: (0, 0)),
                pl.BlockSpec((1, C), lambda j: (0, 0)),
            ],
            out_specs=pl.BlockSpec((B, tn), lambda j: (0, j)),
        ),
        compiler_params=pltpu.CompilerParams(
            dimension_semantics=("parallel",),
            vmem_limit_bytes=budget,
        ),
    )(global_feat, w_t, gamma, beta)

    return cls_pad[:, :N], global_feat


def _reference(x_nchw, classifier_weight, bn_gamma, bn_beta):
    # Pure-JAX reference mirroring the PyTorch forward (training, bnneck).
    xf = x_nchw.astype(jnp.float32)
    gf = jnp.mean(xf, axis=(2, 3))
    mu = jnp.mean(gf, axis=0, keepdims=True)
    var = jnp.mean((gf - mu) ** 2, axis=0, keepdims=True)
    feat = (gf - mu) / jnp.sqrt(var + BN_EPS)
    feat = feat * bn_gamma[None, :].astype(jnp.float32) \
        + bn_beta[None, :].astype(jnp.float32)
    cls = feat @ classifier_weight.astype(jnp.float32).T
    return cls, gf


if __name__ == "__main__":
    key = jax.random.PRNGKey(0)
    k1, k2, k3, k4, k5, k6, k7, k8 = jax.random.split(key, 8)

    # ---- test 1: small shapes, single-tile fast path (thw == HW, tc == C) ----
    B, C, H, W, N = 4, 192, 7, 7, 37
    x = jax.random.normal(k1, (B, C, H, W), dtype=jnp.float32)
    cls_w = 0.001 * jax.random.normal(k2, (N, C), dtype=jnp.float32)   # std=0.001 init
    gamma = 1.0 + 0.1 * jax.random.normal(k3, (C,), dtype=jnp.float32)
    beta = 0.05 * jax.random.normal(k4, (C,), dtype=jnp.float32)

    cls_score, global_feat = backbone_head(x, cls_w, gamma, beta)
    jax.block_until_ready((cls_score, global_feat))
    ref_cls, ref_gf = _reference(x, cls_w, gamma, beta)
    assert cls_score.shape == (B, N) and global_feat.shape == (B, C)
    assert jnp.allclose(global_feat, ref_gf, atol=1e-5, rtol=1e-5)
    assert jnp.allclose(cls_score, ref_cls, atol=1e-4, rtol=1e-4)

    # ---- test 2: forced multi-tile path (C tiles, ragged masked HW tile, N pad) ----
    B2, C2, H2, W2, N2 = 3, 256, 12, 12, 150
    x2 = jax.random.normal(k5, (B2, C2, H2, W2), dtype=jnp.float32)
    w2 = 0.001 * jax.random.normal(k6, (N2, C2), dtype=jnp.float32)
    g2 = 1.0 + 0.1 * jax.random.normal(k7, (C2,), dtype=jnp.float32)
    b2 = 0.05 * jax.random.normal(k8, (C2,), dtype=jnp.float32)
    cls2, gf2 = backbone_head(x2, w2, g2, b2, c_tile=128, hw_tile=128)
    jax.block_until_ready((cls2, gf2))
    r_cls2, r_gf2 = _reference(x2, w2, g2, b2)
    assert jnp.allclose(gf2, r_gf2, atol=1e-5, rtol=1e-5)
    assert jnp.allclose(cls2, r_cls2, atol=1e-4, rtol=1e-4)

    # ---- test 3: bf16 feature map + bf16 MXU classifier (halved HBM traffic) ----
    cls_bf, gf_bf = backbone_head(x.astype(jnp.bfloat16),
                                  cls_w.astype(jnp.bfloat16), gamma, beta)
    jax.block_until_ready((cls_bf, gf_bf))
    assert bool(jnp.all(jnp.isfinite(cls_bf))) and bool(jnp.all(jnp.isfinite(gf_bf)))

    print("KERNEL_OK")
</pallas_src>

<mosaic_0001>
module attributes {stable_mosaic.version = 11 : i64} {
  func.func @_gap_kernel(%arg0: i32, %arg1: i32, %arg2: memref<4x192x49xf32, #tpu.memory_space<vmem>>, %arg3: memref<4x192xf32, #tpu.memory_space<vmem>>) attributes {dimension_semantics = [#tpu.dimension_semantics<parallel>, #tpu.dimension_semantics<arbitrary>], iteration_bounds = array<i64: 1, 1>, scalar_prefetch = 0 : i64, scratch_operands = 0 : i64, tpu.core_type = #tpu.core_type<tc>, window_params = [{transform_indices = @transform_0, window_bounds = array<i64: 4, 192, 49>}, {transform_indices = @transform_1, window_bounds = array<i64: 4, 192>}]} {
    %c0_i32 = arith.constant 0 : i32
    %0 = arith.cmpi eq, %arg1, %c0_i32 : i32
    %1 = arith.extui %0 : i1 to i32
    %c0_i32_0 = arith.constant 0 : i32
    %2 = arith.cmpi ne, %1, %c0_i32_0 : i32
    scf.if %2 {
      %cst_9 = arith.constant 0.000000e+00 : f32
      %11 = vector.broadcast %cst_9 : f32 to vector<4x192xf32>
      %c0_10 = arith.constant 0 : index
      %c0_11 = arith.constant 0 : index
      %12 = vector.load %arg3[%c0_10, %c0_11] : memref<4x192xf32, #tpu.memory_space<vmem>>, vector<4x192xf32>
      tpu.vector_store %arg3[%c0_10, %c0_11], %11 {strides = array<i32>} : memref<4x192xf32, #tpu.memory_space<vmem>>, vector<4x192xf32>,
    } else {
    }
    %c0 = arith.constant 0 : index
    %c0_1 = arith.constant 0 : index
    %3 = vector.load %arg3[%c0, %c0_1] : memref<4x192xf32, #tpu.memory_space<vmem>>, vector<4x192xf32>
    %c0_2 = arith.constant 0 : index
    %c0_3 = arith.constant 0 : index
    %c0_4 = arith.constant 0 : index
    %4 = vector.load %arg2[%c0_2, %c0_3, %c0_4] : memref<4x192x49xf32, #tpu.memory_space<vmem>>, vector<4x192x49xf32>
    %cst = arith.constant dense<0.000000e+00> : vector<4x192xf32>
    %5 = vector.multi_reduction <add>, %4, %cst [2] : vector<4x192x49xf32> to vector<4x192xf32>
    %6 = arith.addf %3, %5 : vector<4x192xf32>
    %c0_5 = arith.constant 0 : index
    %c0_6 = arith.constant 0 : index
    %7 = vector.load %arg3[%c0_5, %c0_6] : memref<4x192xf32, #tpu.memory_space<vmem>>, vector<4x192xf32>
    tpu.vector_store %arg3[%c0_5, %c0_6], %6 {strides = array<i32>} : memref<4x192xf32, #tpu.memory_space<vmem>>, vector<4x192xf32>,
    %c0_i32_7 = arith.constant 0 : i32
    %8 = arith.cmpi eq, %arg1, %c0_i32_7 : i32
    %9 = arith.extui %8 : i1 to i32
    %c0_i32_8 = arith.constant 0 : i32
    %10 = arith.cmpi ne, %9, %c0_i32_8 : i32
    scf.if %10 {
      %c0_9 = arith.constant 0 : index
      %c0_10 = arith.constant 0 : index
      %11 = vector.load %arg3[%c0_9, %c0_10] : memref<4x192xf32, #tpu.memory_space<vmem>>, vector<4x192xf32>
      %cst_11 = arith.constant 0.0204081628 : f32
      %12 = vector.broadcast %cst_11 : f32 to vector<4x192xf32>
      %13 = arith.mulf %11, %12 : vector<4x192xf32>
      %c0_12 = arith.constant 0 : index
      %c0_13 = arith.constant 0 : index
      %14 = vector.load %arg3[%c0_12, %c0_13] : memref<4x192xf32, #tpu.memory_space<vmem>>, vector<4x192xf32>
      tpu.vector_store %arg3[%c0_12, %c0_13], %13 {strides = array<i32>} : memref<4x192xf32, #tpu.memory_space<vmem>>, vector<4x192xf32>,
    } else {
    }
    return
  }
  func.func @transform_0(%arg0: i32, %arg1: i32) -> (i32, i32, i32) {
    %c0_i32 = arith.constant 0 : i32
    %c0_i32_0 = arith.constant 0 : i32
    return %c0_i32, %arg0, %arg1 : i32, i32, i32
  }
  func.func @transform_1(%arg0: i32, %arg1: i32) -> (i32, i32) {
    %c0_i32 = arith.constant 0 : i32
    %c0_i32_0 = arith.constant 0 : i32
    return %c0_i32, %arg0 : i32, i32
  }
}

</mosaic_0001>

<bundles_post_ra>
// kernel: tpu_custom_call.1
= control target key start
LH: loop header
LB: loop body
LE: loop exit
PB: predicated region body
PF: predicated region fallthrough
CT: control target
= control target key end

     0   :  { %vm114_vm0 = vcmask 400384   ;;  %s4125_s0 = inlined_call_operand.vmem [shape: f32[4,192,49], index: 0, kind: input, shape index: {}]   ;;  %s4126_s1 = inlined_call_operand.hbm [shape: f32[4,192], index: 1, kind: output, shape index: {}]  }
   0x1   :  { %v20_v0 = vld [vmem:[%s4125_s0 + $0x10] sm:$0xff]  ;;  %v18_v1 = vld [vmem:[%s4125_s0] sm:$0xff]  ;;  %v21_v2 = vld [vmem:[%s4125_s0 + $0x18] sm:$0xff] }
   0x2   :  { %v121_v3 = vsel %vm114_vm0, %v20_v0, 0.0  ;;  %v115_v4 = vsel %vm114_vm0, %v18_v1, 0.0  ;;  %v19_v5 = vld [vmem:[%s4125_s0 + $0x8] sm:$0xff]  ;;  %v124_v6 = vsel %vm114_vm0, %v21_v2, 0.0  ;;  %v22_v9 = vld [vmem:[%s4125_s0 + $0x20] sm:$0xff]  ;;  %v25_v12 = vld [vmem:[%s4125_s0 + $0x38] sm:$0xff] }
   0x3   :  { %122 = vadd.xlane.f32.xlu1 %v121_v3  ;;  %116 = vadd.xlane.f32.xlu0 %v115_v4  ;;  %v118_v7 = vsel %vm114_vm0, %v19_v5, 0.0  ;;  %v23_v8 = vld [vmem:[%s4125_s0 + $0x28] sm:$0xff]  ;;  %v127_v11 = vsel %vm114_vm0, %v22_v9, 0.0  ;;  %v24_v13 = vld [vmem:[%s4125_s0 + $0x30] sm:$0xff]  ;;  %v136_v14 = vsel %vm114_vm0, %v25_v12, 0.0  ;;  %v26_v17 = vld [vmem:[%s4125_s0 + $0x40] sm:$0xff] }
   0x4   :  { %v130_v10 = vsel %vm114_vm0, %v23_v8, 0.0  ;;  %v133_v15 = vsel %vm114_vm0, %v24_v13, 0.0  ;;  %v27_v16 = vld [vmem:[%s4125_s0 + $0x48] sm:$0xff]  ;;  %v139_v19 = vsel %vm114_vm0, %v26_v17, 0.0  ;;  %v29_v20 = vld [vmem:[%s4125_s0 + $0x58] sm:$0xff]  ;;  %v28_v21 = vld [vmem:[%s4125_s0 + $0x50] sm:$0xff] }
   0x5   :  { %v142_v18 = vsel %vm114_vm0, %v27_v16, 0.0  ;;  %v148_v22 = vsel %vm114_vm0, %v29_v20, 0.0  ;;  %v145_v23 = vsel %vm114_vm0, %v28_v21, 0.0  ;;  %v31_v24 = vld [vmem:[%s4125_s0 + $0x68] sm:$0xff]  ;;  %v30_v25 = vld [vmem:[%s4125_s0 + $0x60] sm:$0xff]  ;;  %v33_v28 = vld [vmem:[%s4125_s0 + $0x78] sm:$0xff] }
   0x6   :  { %v154_v26 = vsel %vm114_vm0, %v31_v24, 0.0  ;;  %v151_v27 = vsel %vm114_vm0, %v30_v25, 0.0  ;;  %v32_v29 = vld [vmem:[%s4125_s0 + $0x70] sm:$0xff]  ;;  %v160_v30 = vsel %vm114_vm0, %v33_v28, 0.0 }
   0x7   :  { %125 = vadd.xlane.f32.xlu1 %v124_v6  ;;  %119 = vadd.xlane.f32.xlu0 %v118_v7  ;;  %v157_v31 = vsel %vm114_vm0, %v32_v29, 0.0 }
   0xb   :  { %131 = vadd.xlane.f32.xlu1 %v130_v10  ;;  %128 = vadd.xlane.f32.xlu0 %v127_v11 }
   0xf   :  { %137 = vadd.xlane.f32.xlu1 %v136_v14  ;;  %134 = vadd.xlane.f32.xlu0 %v133_v15 }
  0x13   :  { %143 = vadd.xlane.f32.xlu1 %v142_v18  ;;  %140 = vadd.xlane.f32.xlu0 %v139_v19 }
  0x17   :  { %149 = vadd.xlane.f32.xlu1 %v148_v22  ;;  %146 = vadd.xlane.f32.xlu0 %v145_v23 }
  0x1b   :  { %155 = vadd.xlane.f32.xlu1 %v154_v26  ;;  %152 = vadd.xlane.f32.xlu0 %v151_v27 }
  0x1c   :  { %6 = vsyncpa [#allocation3], 0  ;;  %v35_v32 = vld [vmem:[%s4125_s0 + $0x88] sm:$0xff]  ;;  %v34_v33 = vld [vmem:[%s4125_s0 + $0x80] sm:$0xff]  ;;  %v2798_v20 = vmov 0   ;;  %vm4127_vm1 = vcmask 130112  }
  0x1d   :  { %v166_v34 = vsel %vm114_vm0, %v35_v32, 0.0  ;;  %v163_v35 = vsel %vm114_vm0, %v34_v33, 0.0  ;;  %v37_v36 = vld [vmem:[%s4125_s0 + $0x98] sm:$0xff]  ;;  %v36_v37 = vld [vmem:[%s4125_s0 + $0x90] sm:$0xff]  ;;  %v39_v40 = vld [vmem:[%s4125_s0 + $0xa8] sm:$0xff]  ;;  %2773 = vset.pattern.permute.xlu1 %v2798_v20  ;;  %2772 = vset.pattern.permute.xlu0 %v2798_v20  ;;  %vm2245_vm2 = vcmask 195712  }
  0x1e   :  { %v172_v38 = vsel %vm114_vm0, %v37_v36, 0.0  ;;  %v169_v39 = vsel %vm114_vm0, %v36_v37, 0.0  ;;  %v38_v41 = vld [vmem:[%s4125_s0 + $0xa0] sm:$0xff]  ;;  %v178_v42 = vsel %vm114_vm0, %v39_v40, 0.0  ;;  %v41_v44 = vld [vmem:[%s4125_s0 + $0xb8] sm:$0xff]  ;;  %v40_v45 = vld [vmem:[%s4125_s0 + $0xb0] sm:$0xff] }
  0x1f   :  { %161 = vadd.xlane.f32.xlu1 %v160_v30  ;;  %158 = vadd.xlane.f32.xlu0 %v157_v31  ;;  %v175_v43 = vsel %vm114_vm0, %v38_v41, 0.0  ;;  %v184_v46 = vsel %vm114_vm0, %v41_v44, 0.0  ;;  %v181_v47 = vsel %vm114_vm0, %v40_v45, 0.0  ;;  %v43_v48 = vld [vmem:[%s4125_s0 + $0xc8] sm:$0xff]  ;;  %v42_v49 = vld [vmem:[%s4125_s0 + $0xc0] sm:$0xff]  ;;  %v45_v52 = vld [vmem:[%s4125_s0 + $0xd8] sm:$0xff] }
  0x20   :  { %v190_v50 = vsel %vm114_vm0, %v43_v48, 0.0  ;;  %v187_v51 = vsel %vm114_vm0, %v42_v49, 0.0  ;;  %v44_v53 = vld [vmem:[%s4125_s0 + $0xd0] sm:$0xff]  ;;  %v196_v54 = vsel %vm114_vm0, %v45_v52, 0.0  ;;  %v47_v56 = vld [vmem:[%s4125_s0 + $0xe8] sm:$0xff]  ;;  %v46_v57 = vld [vmem:[%s4125_s0 + $0xe0] sm:$0xff] }
  0x21   :  { %v193_v55 = vsel %vm114_vm0, %v44_v53, 0.0  ;;  %v202_v58 = vsel %vm114_vm0, %v47_v56, 0.0  ;;  %v199_v59 = vsel %vm114_vm0, %v46_v57, 0.0  ;;  %v49_v60 = vld [vmem:[%s4125_s0 + $0xf8] sm:$0xff]  ;;  %v48_v61 = vld [vmem:[%s4125_s0 + $0xf0] sm:$0xff]  ;;  %v51_v0 = vld [vmem:[%s4125_s0 + $0x108] sm:$0xff] }
  0x22   :  { %v208_v62 = vsel %vm114_vm0, %v49_v60, 0.0  ;;  %v205_v63 = vsel %vm114_vm0, %v48_v61, 0.0  ;;  %v50_v1 = vld [vmem:[%s4125_s0 + $0x100] sm:$0xff]  ;;  %v214_v2 = vsel %vm114_vm0, %v51_v0, 0.0  ;;  %v53_v4 = vld [vmem:[%s4125_s0 + $0x118] sm:$0xff]  ;;  %v52_v5 = vld [vmem:[%s4125_s0 + $0x110] sm:$0xff] }
  0x23   :  { %167 = vadd.xlane.f32.xlu1 %v166_v34  ;;  %164 = vadd.xlane.f32.xlu0 %v163_v35  ;;  %v211_v3 = vsel %vm114_vm0, %v50_v1, 0.0  ;;  %v220_v6 = vsel %vm114_vm0, %v53_v4, 0.0  ;;  %v217_v7 = vsel %vm114_vm0, %v52_v5, 0.0  ;;  %v55_v8 = vld [vmem:[%s4125_s0 + $0x128] sm:$0xff]  ;;  %v54_v9 = vld [vmem:[%s4125_s0 + $0x120] sm:$0xff]  ;;  %v57_v12 = vld [vmem:[%s4125_s0 + $0x138] sm:$0xff] }
  0x24   :  { %v226_v10 = vsel %vm114_vm0, %v55_v8, 0.0  ;;  %v223_v11 = vsel %vm114_vm0, %v54_v9, 0.0  ;;  %v56_v13 = vld [vmem:[%s4125_s0 + $0x130] sm:$0xff]  ;;  %v232_v14 = vsel %vm114_vm0, %v57_v12, 0.0  ;;  %v59_v16 = vld [vmem:[%s4125_s0 + $0x148] sm:$0xff]  ;;  %v58_v17 = vld [vmem:[%s4125_s0 + $0x140] sm:$0xff] }
  0x25   :  { %v229_v15 = vsel %vm114_vm0, %v56_v13, 0.0  ;;  %v238_v18 = vsel %vm114_vm0, %v59_v16, 0.0  ;;  %v235_v19 = vsel %vm114_vm0, %v58_v17, 0.0  ;;  %v61_v21 = vld [vmem:[%s4125_s0 + $0x158] sm:$0xff]  ;;  %v60_v22 = vld [vmem:[%s4125_s0 + $0x150] sm:$0xff]  ;;  %v63_v25 = vld [vmem:[%s4125_s0 + $0x168] sm:$0xff] }
  0x26   :  { %v244_v23 = vsel %vm114_vm0, %v61_v21, 0.0  ;;  %v241_v24 = vsel %vm114_vm0, %v60_v22, 0.0  ;;  %v62_v26 = vld [vmem:[%s4125_s0 + $0x160] sm:$0xff]  ;;  %v250_v27 = vsel %vm114_vm0, %v63_v25, 0.0  ;;  %v65_v29 = vld [vmem:[%s4125_s0 + $0x178] sm:$0xff]  ;;  %v64_v30 = vld [vmem:[%s4125_s0 + $0x170] sm:$0xff] }
  0x27   :  { %173 = vadd.xlane.f32.xlu1 %v172_v38  ;;  %170 = vadd.xlane.f32.xlu0 %v169_v39  ;;  %v247_v28 = vsel %vm114_vm0, %v62_v26, 0.0  ;;  %v256_v31 = vsel %vm114_vm0, %v65_v29, 0.0  ;;  %v253_v32 = vsel %vm114_vm0, %v64_v30, 0.0  ;;  %v67_v33 = vld [vmem:[%s4125_s0 + $0x188] sm:$0xff]  ;;  %v66_v34 = vld [vmem:[%s4125_s0 + $0x180] sm:$0xff]  ;;  %v69_v37 = vld [vmem:[%s4125_s0 + $0x198] sm:$0xff] }
  0x28   :  { %v262_v35 = vsel %vm114_vm0, %v67_v33, 0.0  ;;  %v259_v36 = vsel %vm114_vm0, %v66_v34, 0.0  ;;  %v68_v38 = vld [vmem:[%s4125_s0 + $0x190] sm:$0xff]  ;;  %v268_v39 = vsel %vm114_vm0, %v69_v37, 0.0  ;;  %v71_v41 = vld [vmem:[%s4125_s0 + $0x1a8] sm:$0xff]  ;;  %v73_v45 = vld [vmem:[%s4125_s0 + $0x1b8] sm:$0xff] }
  0x29   :  { %v265_v40 = vsel %vm114_vm0, %v68_v38, 0.0  ;;  %v75_v49 = vld [vmem:[%s4125_s0 + $0x1c8] sm:$0xff]  ;;  %v77_v53 = vld [vmem:[%s4125_s0 + $0x1d8] sm:$0xff]  ;;  %v94_v30 = vld [vmem:[%s4125_s0 + $0x260] sm:$0xff]  ;;  %vm2252_vm3 = vcmask 261312   ;;  %vm2259_vm4 = vcmask 326912  }
  0x2a   :  { %v79_v57 = vld [vmem:[%s4125_s0 + $0x1e8] sm:$0xff]  ;;  %v81_v61 = vld [vmem:[%s4125_s0 + $0x1f8] sm:$0xff]  ;;  %v343_v33 = vsel %vm114_vm0, %v94_v30, 0.0  ;;  %vm2266_vm5 = vcmask 392512   ;;  %vm2273_vm6 = vcmask 458112   ;;  %vm2280_vm7 = vcmask 523712  }
  0x2b   :  { %179 = vadd.xlane.f32.xlu1 %v178_v42  ;;  %176 = vadd.xlane.f32.xlu0 %v175_v43  ;;  %v70_v42 = vld [vmem:[%s4125_s0 + $0x1a0] sm:$0xff]  ;;  %v274_v43 = vsel %vm114_vm0, %v71_v41, 0.0  ;;  %v83_v1 = vld [vmem:[%s4125_s0 + $0x208] sm:$0xff]  ;;  %v85_v5 = vld [vmem:[%s4125_s0 + $0x218] sm:$0xff]  ;;  %vm2287_vm8 = vcmask 589312   ;;  %vm2294_vm9 = vcmask 654912  }
  0x2c   :  { %v271_v44 = vsel %vm114_vm0, %v70_v42, 0.0  ;;  %v87_v9 = vld [vmem:[%s4125_s0 + $0x228] sm:$0xff]  ;;  %v89_v13 = vld [vmem:[%s4125_s0 + $0x238] sm:$0xff]  ;;  %v98_v42 = vld [vmem:[%s4125_s0 + $0x280] sm:$0xff]  ;;  %vm2301_vm10 = vcmask 720512   ;;  %vm2308_vm11 = vcmask 786112  }
  0x2d   :  { %v91_v17 = vld [vmem:[%s4125_s0 + $0x248] sm:$0xff]  ;;  %vm2315_vm12 = vcmask 851712   ;;  %vm4129_vm13 = vcmask 917312   ;;  %vm2329_vm14 = vcmask 982912   ;;  %vm4128_vm15 = vcmask 1048512  }
  0x2e   :  { %v334_v20 = vsel %vm114_vm0, %v91_v17, 0.0  ;;  %v95_v29 = vld [vmem:[%s4125_s0 + $0x268] sm:$0xff] }
  0x2f   :  { %185 = vadd.xlane.f32.xlu1 %v184_v46  ;;  %182 = vadd.xlane.f32.xlu0 %v181_v47  ;;  %v72_v46 = vld [vmem:[%s4125_s0 + $0x1b0] sm:$0xff]  ;;  %v280_v47 = vsel %vm114_vm0, %v73_v45, 0.0  ;;  %v99_v41 = vld [vmem:[%s4125_s0 + $0x288] sm:$0xff]  ;;  %v355_v45 = vsel %vm114_vm0, %v98_v42, 0.0 }
  0x30   :  { %v277_v48 = vsel %vm114_vm0, %v72_v46, 0.0 }
  0x33   :  { %191 = vadd.xlane.f32.xlu1 %v190_v50  ;;  %188 = vadd.xlane.f32.xlu0 %v187_v51  ;;  %v74_v50 = vld [vmem:[%s4125_s0 + $0x1c0] sm:$0xff]  ;;  %v286_v51 = vsel %vm114_vm0, %v75_v49, 0.0 }
  0x34   :  { %v283_v52 = vsel %vm114_vm0, %v74_v50, 0.0 }
  0x37   :  { %197 = vadd.xlane.f32.xlu1 %v196_v54  ;;  %194 = vadd.xlane.f32.xlu0 %v193_v55  ;;  %v76_v54 = vld [vmem:[%s4125_s0 + $0x1d0] sm:$0xff]  ;;  %v292_v55 = vsel %vm114_vm0, %v77_v53, 0.0  ;;  %v103_v53 = vld [vmem:[%s4125_s0 + $0x2a8] sm:$0xff] }
  0x38   :  { %v289_v56 = vsel %vm114_vm0, %v76_v54, 0.0  ;;  %v102_v54 = vld [vmem:[%s4125_s0 + $0x2a0] sm:$0xff] }
  0x3b   :  { %203 = vadd.xlane.f32.xlu1 %v202_v58  ;;  %200 = vadd.xlane.f32.xlu0 %v199_v59  ;;  %v78_v58 = vld [vmem:[%s4125_s0 + $0x1e0] sm:$0xff]  ;;  %v298_v59 = vsel %vm114_vm0, %v79_v57, 0.0  ;;  %v367_v57 = vsel %vm114_vm0, %v102_v54, 0.0 }
  0x3c   :  { %v295_v60 = vsel %vm114_vm0, %v78_v58, 0.0 }
  0x3f   :  { %209 = vadd.xlane.f32.xlu1 %v208_v62  ;;  %206 = vadd.xlane.f32.xlu0 %v205_v63  ;;  %v80_v62 = vld [vmem:[%s4125_s0 + $0x1f0] sm:$0xff]  ;;  %v304_v63 = vsel %vm114_vm0, %v81_v61, 0.0 }
  0x40   :  { %v301_v0 = vsel %vm114_vm0, %v80_v62, 0.0 }
  0x43   :  { %215 = vadd.xlane.f32.xlu1 %v214_v2  ;;  %212 = vadd.xlane.f32.xlu0 %v211_v3  ;;  %v82_v2 = vld [vmem:[%s4125_s0 + $0x200] sm:$0xff]  ;;  %v310_v3 = vsel %vm114_vm0, %v83_v1, 0.0  ;;  %v107_v1 = vld [vmem:[%s4125_s0 + $0x2c8] sm:$0xff] }
  0x44   :  { %v307_v4 = vsel %vm114_vm0, %v82_v2, 0.0  ;;  %v106_v2 = vld [vmem:[%s4125_s0 + $0x2c0] sm:$0xff] }
  0x47   :  { %221 = vadd.xlane.f32.xlu1 %v220_v6  ;;  %218 = vadd.xlane.f32.xlu0 %v217_v7  ;;  %v84_v6 = vld [vmem:[%s4125_s0 + $0x210] sm:$0xff]  ;;  %v316_v7 = vsel %vm114_vm0, %v85_v5, 0.0  ;;  %v379_v5 = vsel %vm114_vm0, %v106_v2, 0.0 }
  0x48   :  { %v313_v8 = vsel %vm114_vm0, %v84_v6, 0.0 }
  0x4b   :  { %227 = vadd.xlane.f32.xlu1 %v226_v10  ;;  %224 = vadd.xlane.f32.xlu0 %v223_v11  ;;  %v86_v10 = vld [vmem:[%s4125_s0 + $0x220] sm:$0xff]  ;;  %v322_v11 = vsel %vm114_vm0, %v87_v9, 0.0 }
  0x4c   :  { %v319_v12 = vsel %vm114_vm0, %v86_v10, 0.0 }
  0x4f   :  { %233 = vadd.xlane.f32.xlu1 %v232_v14  ;;  %230 = vadd.xlane.f32.xlu0 %v229_v15  ;;  %v88_v14 = vld [vmem:[%s4125_s0 + $0x230] sm:$0xff]  ;;  %v328_v15 = vsel %vm114_vm0, %v89_v13, 0.0  ;;  %v111_v13 = vld [vmem:[%s4125_s0 + $0x2e8] sm:$0xff] }
  0x50   :  { %v325_v16 = vsel %vm114_vm0, %v88_v14, 0.0  ;;  %v110_v14 = vld [vmem:[%s4125_s0 + $0x2e0] sm:$0xff] }
  0x51   :  { %v391_v17 = vsel %vm114_vm0, %v110_v14, 0.0 }
  0x53   :  { %239 = vadd.xlane.f32.xlu1 %v238_v18  ;;  %236 = vadd.xlane.f32.xlu0 %v235_v19  ;;  %v90_v18 = vld [vmem:[%s4125_s0 + $0x240] sm:$0xff] }
  0x54   :  { %v331_v21 = vsel %vm114_vm0, %v90_v18, 0.0 }
  0x57   :  { %245 = vadd.xlane.f32.xlu1 %v244_v23  ;;  %242 = vadd.xlane.f32.xlu0 %v241_v24  ;;  %v93_v23 = vld [vmem:[%s4125_s0 + $0x258] sm:$0xff]  ;;  %v92_v24 = vld [vmem:[%s4125_s0 + $0x250] sm:$0xff] }
  0x58   :  { %v340_v26 = vsel %vm114_vm0, %v93_v23, 0.0 }
  0x5b   :  { %251 = vadd.xlane.f32.xlu1 %v250_v27  ;;  %248 = vadd.xlane.f32.xlu0 %v247_v28  ;;  %v337_v27 = vsel %vm114_vm0, %v92_v24, 0.0 }
  0x5f   :  { %257 = vadd.xlane.f32.xlu1 %v256_v31  ;;  %254 = vadd.xlane.f32.xlu0 %v253_v32  ;;  %v346_v32 = vsel %vm114_vm0, %v95_v29, 0.0  ;;  %v2799_v29 = vmov 839922192  }
  0x60   :  { %v500_v30 = vunpack.c.l.s4 %v2799_v29 }
  0x63   :  { %263 = vadd.xlane.f32.xlu1 %v262_v35  ;;  %260 = vadd.xlane.f32.xlu0 %v259_v36  ;;  %v97_v35 = vld [vmem:[%s4125_s0 + $0x278] sm:$0xff]  ;;  %v96_v36 = vld [vmem:[%s4125_s0 + $0x270] sm:$0xff] }
  0x64   :  { %v352_v38 = vsel %vm114_vm0, %v97_v35, 0.0 }
  0x67   :  { %269 = vadd.xlane.f32.xlu1 %v268_v39  ;;  %266 = vadd.xlane.f32.xlu0 %v265_v40  ;;  %v349_v39 = vsel %vm114_vm0, %v96_v36, 0.0 }
  0x6b   :  { %275 = vadd.xlane.f32.xlu1 %v274_v43  ;;  %272 = vadd.xlane.f32.xlu0 %v271_v44  ;;  %v358_v44 = vsel %vm114_vm0, %v99_v41, 0.0 }
  0x6f   :  { %281 = vadd.xlane.f32.xlu1 %v280_v47  ;;  %278 = vadd.xlane.f32.xlu0 %v277_v48  ;;  %v101_v47 = vld [vmem:[%s4125_s0 + $0x298] sm:$0xff]  ;;  %v100_v48 = vld [vmem:[%s4125_s0 + $0x290] sm:$0xff] }
  0x70   :  { %v364_v50 = vsel %vm114_vm0, %v101_v47, 0.0 }
  0x73   :  { %287 = vadd.xlane.f32.xlu1 %v286_v51  ;;  %284 = vadd.xlane.f32.xlu0 %v283_v52  ;;  %v361_v51 = vsel %vm114_vm0, %v100_v48, 0.0 }
  0x77   :  { %293 = vadd.xlane.f32.xlu1 %v292_v55  ;;  %290 = vadd.xlane.f32.xlu0 %v289_v56  ;;  %v370_v56 = vsel %vm114_vm0, %v103_v53, 0.0 }
  0x7b   :  { %299 = vadd.xlane.f32.xlu1 %v298_v59  ;;  %296 = vadd.xlane.f32.xlu0 %v295_v60  ;;  %v105_v59 = vld [vmem:[%s4125_s0 + $0x2b8] sm:$0xff]  ;;  %v104_v60 = vld [vmem:[%s4125_s0 + $0x2b0] sm:$0xff] }
  0x7c   :  { %v376_v62 = vsel %vm114_vm0, %v105_v59, 0.0 }
  0x7f   :  { %305 = vadd.xlane.f32.xlu1 %v304_v63  ;;  %302 = vadd.xlane.f32.xlu0 %v301_v0  ;;  %v373_v63 = vsel %vm114_vm0, %v104_v60, 0.0 }
  0x83   :  { %311 = vadd.xlane.f32.xlu1 %v310_v3  ;;  %308 = vadd.xlane.f32.xlu0 %v307_v4  ;;  %v382_v4 = vsel %vm114_vm0, %v107_v1, 0.0 }
  0x87   :  { %317 = vadd.xlane.f32.xlu1 %v316_v7  ;;  %314 = vadd.xlane.f32.xlu0 %v313_v8  ;;  %v109_v7 = vld [vmem:[%s4125_s0 + $0x2d8] sm:$0xff]  ;;  %v108_v8 = vld [vmem:[%s4125_s0 + $0x2d0] sm:$0xff] }
  0x88   :  { %v388_v10 = vsel %vm114_vm0, %v109_v7, 0.0 }
  0x8b   :  { %323 = vadd.xlane.f32.xlu1 %v322_v11  ;;  %320 = vadd.xlane.f32.xlu0 %v319_v12  ;;  %v385_v11 = vsel %vm114_vm0, %v108_v8, 0.0 }
  0x8f   :  { %329 = vadd.xlane.f32.xlu1 %v328_v15  ;;  %326 = vadd.xlane.f32.xlu0 %v325_v16  ;;  %v394_v16 = vsel %vm114_vm0, %v111_v13, 0.0 }
  0x90   :  { %v3107_v19 = vpop.xlane.xlu1 %122  ;;  %v3111_v22 = vpop.xlane.xlu0 %116 }
  0x93   :  { %335 = vadd.xlane.f32.xlu1 %v334_v20  ;;  %332 = vadd.xlane.f32.xlu0 %v331_v21  ;;  %v113_v20 = vld [vmem:[%s4125_s0 + $0x2f8] sm:$0xff]  ;;  %v112_v21 = vld [vmem:[%s4125_s0 + $0x2f0] sm:$0xff]  ;;  %s2802_s0 = smov [#allocation2]  }
  0x94   :  { %v3119_v25 = vpop.xlane.xlu1 %125  ;;  %v3123_v28 = vpop.xlane.xlu0 %119  ;;  %v400_v24 = vsel %vm114_vm0, %v113_v20, 0.0  ;;  %s2759_s24 = sshll.u32 %s2802_s0, 4  ;;  %s2760_s24 = int_to_ptr.vmem [resolvable:$true] %s2759_s24 }
  0x95   :  { %s2774_s25 = scalar_lea.vmem %s2760_s24, 128  ;;  %p2779_p1 = scmp.lt.s32.totalorder %s2760_s24, %s2760_s24 }
  0x96   :  { %p2775_p0 = scmp.ne.s32.totalorder %s2760_s24, %s2774_s25  ;;  %p2780_p2 = scmp.lt.s32.totalorder %s2774_s25, %s2774_s25 }
  0x97   :  { %341 = vadd.xlane.f32.xlu1 %v340_v26  ;;  %338 = vadd.xlane.f32.xlu0 %v337_v27  ;;  %v397_v26 = vsel %vm114_vm0, %v112_v21, 0.0  ;;  %vm13_vm0 = vcmask 1043456  }
  0x98   :  { %v3131_v31 = vpop.xlane.xlu1 %131  ;;  %v3135_v34 = vpop.xlane.xlu0 %128  ;;  %p2781_p3 = por %p2780_p2, %p2779_p1 }
  0x9a   :  { %p2782_p4 = pnand %p2781_p3, %p2775_p0 }
  0x9b   :  { %347 = vadd.xlane.f32.xlu1 %v346_v32  ;;  %344 = vadd.xlane.f32.xlu0 %v343_v33  ;;  %v502_v32 = vlaneseq  ;;  %v2800_v33 = vmov 1985246804  }
  0x9c   :  { %v3143_v37 = vpop.xlane.xlu1 %137  ;;  %v3147_v40 = vpop.xlane.xlu0 %134  ;;  %v507_v35 = vunpack.c.l.s4 %v2800_v33 }
  0x9d   :  { %v3250_v41 = vshrl.u32 %v502_v32, 7 }
  0x9e   :  { %v508_v42 = vunpack.c.0.s8 %v507_v35 }
  0x9f   :  { %353 = vadd.xlane.f32.xlu1 %v352_v38  ;;  %350 = vadd.xlane.f32.xlu0 %v349_v39  ;;  %v501_v39 = vunpack.c.0.s8 %v500_v30 }
  0xa0   :  { %v3155_v43 = vpop.xlane.xlu1 %143  ;;  %v3159_v46 = vpop.xlane.xlu0 %140  ;;  %v3260_v48 = vsub.s32 %v508_v42, %v3250_v41 }
  0xa1   :  { %v3257_v47 = vsub.s32 %v501_v39, %v3250_v41 }
  0xa2   :  { %v526_v54 = vrot.slane %v3123_v28, %v3260_v48  ;;  %v540_v60 = vrot.slane %v3107_v19, %v3260_v48  ;;  %v512_v1 = vrot.slane %v3111_v22, %v3260_v48  ;;  %v554_v7 = vrot.slane %v3119_v25, %v3260_v48 }
  0xa3   :  { %359 = vadd.xlane.f32.xlu1 %v358_v44  ;;  %356 = vadd.xlane.f32.xlu0 %v355_v45  ;;  %v519_v53 = vrot.slane %v3123_v28, %v3257_v47  ;;  %v533_v59 = vrot.slane %v3107_v19, %v3257_v47  ;;  %v631_v19 = vrot.slane %v3155_v43, %v3257_v47 }
  0xa4   :  { %v3167_v49 = vpop.xlane.xlu1 %149  ;;  %v3171_v52 = vpop.xlane.xlu0 %146  ;;  %v638_v8 = vrot.slane %v3155_v43, %v3260_v48  ;;  %v561_v14 = vrot.slane %v3135_v34, %v3257_v47  ;;  %v589_v42 = vrot.slane %v3147_v40, %v3257_v47 }
  0xa5   :  { %v666_v43 = vrot.slane %v3167_v49, %v3260_v48 }
  0xa7   :  { %365 = vadd.xlane.f32.xlu1 %v364_v50  ;;  %362 = vadd.xlane.f32.xlu0 %v361_v51 }
  0xa8   :  { %v3179_v55 = vpop.xlane.xlu1 %155  ;;  %v3183_v58 = vpop.xlane.xlu0 %152 }
  0xa9   :  { %v687_v30 = vrot.slane %v3179_v55, %v3257_v47 }
  0xab   :  { %371 = vadd.xlane.f32.xlu1 %v370_v56  ;;  %368 = vadd.xlane.f32.xlu0 %v367_v57 }
  0xac   :  { %v3191_v61 = vpop.xlane.xlu1 %161  ;;  %v3195_v0 = vpop.xlane.xlu0 %158 }
  0xaf   :  { %377 = vadd.xlane.f32.xlu1 %v376_v62  ;;  %374 = vadd.xlane.f32.xlu0 %v373_v63  ;;  %v1844_v62 = vcombine.low %v519_v53, %v526_v54  ;;  %v505_v63 = vrot.slane %v3111_v22, %v3257_v47  ;;  %v715_v54 = vrot.slane %v3191_v61, %v3257_v47 }
  0xb0   :  { %v3203_v3 = vpop.xlane.xlu1 %167  ;;  %v3207_v6 = vpop.xlane.xlu0 %164 }
  0xb3   :  { %383 = vadd.xlane.f32.xlu1 %v382_v4  ;;  %380 = vadd.xlane.f32.xlu0 %v379_v5  ;;  %v1845_v4 = vcombine.low %v533_v59, %v540_v60  ;;  %v547_v5 = vrot.slane %v3119_v25, %v3257_v47  ;;  %v568_v25 = vrot.slane %v3135_v34, %v3260_v48 }
  0xb4   :  { %v3215_v9 = vpop.xlane.xlu1 %173  ;;  %v3219_v12 = vpop.xlane.xlu0 %170 }
  0xb5   :  { %v1846_v13 = vcombine.low %v547_v5, %v554_v7  ;;  %v1847_v34 = vcombine.low %v561_v14, %v568_v25 }
  0xb7   :  { %389 = vadd.xlane.f32.xlu1 %v388_v10  ;;  %386 = vadd.xlane.f32.xlu0 %v385_v11  ;;  %v1843_v10 = vcombine.low %v505_v63, %v512_v1  ;;  %v610_v63 = vrot.slane %v3143_v37, %v3260_v48 }
  0xb8   :  { %v3227_v15 = vpop.xlane.xlu1 %179  ;;  %v3231_v18 = vpop.xlane.xlu0 %176 }
  0xbb   :  { %395 = vadd.xlane.f32.xlu1 %v394_v16  ;;  %392 = vadd.xlane.f32.xlu0 %v391_v17  ;;  %v1852_v16 = vcombine.low %v631_v19, %v638_v8  ;;  %v659_v17 = vrot.slane %v3167_v49, %v3257_v47  ;;  %v694_v49 = vrot.slane %v3179_v55, %v3260_v48 }
  0xbc   :  { %v3239_v23 = vpop.xlane.xlu1 %185  ;;  %v3243_v27 = vpop.xlane.xlu0 %182  ;;  %v722_v55 = vrot.slane %v3191_v61, %v3260_v48  ;;  %v750_v61 = vrot.slane %v3203_v3, %v3260_v48  ;;  %v617_v8 = vrot.slane %v3159_v46, %v3257_v47 }
  0xbd   :  { %v1854_v29 = vcombine.low %v659_v17, %v666_v43  ;;  %v1856_v53 = vcombine.low %v687_v30, %v694_v49  ;;  %v645_v17 = vrot.slane %v3171_v52, %v3257_v47  ;;  %v673_v30 = vrot.slane %v3183_v58, %v3257_v47 }
  0xbe   :  { %v1858_v1 = vcombine.low %v715_v54, %v722_v55  ;;  %v701_v54 = vrot.slane %v3195_v0, %v3257_v47 }
  0xbf   :  { %401 = vadd.xlane.f32.xlu1 %v400_v24  ;;  %398 = vadd.xlane.f32.xlu0 %v397_v26  ;;  %v575_v24 = vrot.slane %v3131_v31, %v3257_v47  ;;  %v582_v26 = vrot.slane %v3131_v31, %v3260_v48  ;;  %v596_v31 = vrot.slane %v3147_v40, %v3260_v48 }
  0xc0   :  { %v3245_v36 = vpop.xlane.xlu1 %191  ;;  %v3247_v38 = vpop.xlane.xlu0 %188 }
  0xc1   :  { %v1848_v39 = vcombine.low %v575_v24, %v582_v26  ;;  %v1849_v40 = vcombine.low %v589_v42, %v596_v31  ;;  %v799_v24 = vrot.slane %v3227_v15, %v3257_v47 }
  0xc4   :  { %v3252_v44 = vpop.xlane.xlu1 %197  ;;  %v3254_v45 = vpop.xlane.xlu0 %194 }
  0xc8   :  { %v3262_v50 = vpop.xlane.xlu1 %203  ;;  %v3264_v51 = vpop.xlane.xlu0 %200 }
  0xcc   :  { %v3270_v56 = vpop.xlane.xlu1 %209  ;;  %v3272_v57 = vpop.xlane.xlu0 %206 }
  0xd0   :  { %v3282_v2 = vpop.xlane.xlu1 %215  ;;  %1943 = vperm.xlu1 %2773, %v1844_v62   ;;  %v3284_v28 = vpop.xlane.xlu0 %212  ;;  %v603_v62 = vrot.slane %v3143_v37, %v3257_v47  ;;  %v624_v37 = vrot.slane %v3159_v46, %v3260_v48  ;;  %v652_v46 = vrot.slane %v3171_v52, %v3260_v48  ;;  %v680_v52 = vrot.slane %v3183_v58, %v3260_v48 }
  0xd1   :  { %v708_v58 = vrot.slane %v3195_v0, %v3260_v48  ;;  %v736_v0 = vrot.slane %v3207_v6, %v3260_v48 }
  0xd2   :  { %v1850_v19 = vcombine.low %v603_v62, %v610_v63  ;;  %v855_v62 = vrot.slane %v3245_v36, %v3257_v47 }
  0xd4   :  { %v3294_v22 = vpop.xlane.xlu1 %221  ;;  %1946 = vperm.xlu1 %2773, %v1845_v4   ;;  %v3296_v11 = vpop.xlane.xlu0 %218  ;;  %v743_v4 = vrot.slane %v3203_v3, %v3257_v47  ;;  %v778_v3 = vrot.slane %v3215_v9, %v3260_v48 }
  0xd5   :  { %1940 = vperm.xlu0 %2772, %v1843_v10  }
  0xd6   :  { %v1860_v10 = vcombine.low %v743_v4, %v750_v61  ;;  %v729_v4 = vrot.slane %v3207_v6, %v3257_v47  ;;  %v764_v6 = vrot.slane %v3219_v12, %v3260_v48 }
  0xd8   :  { %v3306_v20 = vpop.xlane.xlu1 %227  ;;  %1949 = vperm.xlu1 %2773, %v1846_v13   ;;  %v3308_v21 = vpop.xlane.xlu0 %224  ;;  %v771_v13 = vrot.slane %v3215_v9, %v3257_v47  ;;  %v806_v9 = vrot.slane %v3227_v15, %v3260_v48  ;;  %v834_v15 = vrot.slane %v3239_v23, %v3260_v48 }
  0xd9   :  { %1967 = vperm.xlu0 %2772, %v1852_v16   ;;  %v1851_v16 = vcombine.low %v617_v8, %v624_v37 }
  0xda   :  { %v1862_v43 = vcombine.low %v771_v13, %v778_v3  ;;  %v1864_v49 = vcombine.low %v799_v24, %v806_v9  ;;  %v757_v13 = vrot.slane %v3219_v12, %v3257_v47  ;;  %v785_v24 = vrot.slane %v3231_v18, %v3257_v47 }
  0xdb   :  { %v792_v12 = vrot.slane %v3231_v18, %v3260_v48  ;;  %v820_v18 = vrot.slane %v3243_v27, %v3260_v48 }
  0xdc   :  { %v3318_v33 = vpop.xlane.xlu1 %233  ;;  %1952 = vperm.xlu1 %2773, %v1847_v34   ;;  %v3320_v35 = vpop.xlane.xlu0 %230 }
  0xdd   :  { %1973 = vperm.xlu0 %2772, %v1854_v29   ;;  %v1853_v29 = vcombine.low %v645_v17, %v652_v46 }
  0xe0   :  { %v3330_v59 = vpop.xlane.xlu1 %239  ;;  %1955 = vperm.xlu1 %2773, %v1848_v39   ;;  %v3332_v60 = vpop.xlane.xlu0 %236  ;;  %v827_v39 = vrot.slane %v3239_v23, %v3257_v47  ;;  %v862_v23 = vrot.slane %v3245_v36, %v3260_v48  ;;  %v890_v36 = vrot.slane %v3252_v44, %v3260_v48 }
  0xe1   :  { %1979 = vperm.xlu0 %2772, %v1856_v53   ;;  %v1855_v53 = vcombine.low %v673_v30, %v680_v52 }
  0xe2   :  { %v1866_v55 = vcombine.low %v827_v39, %v834_v15  ;;  %v1868_v61 = vcombine.low %v855_v62, %v862_v23  ;;  %v813_v39 = vrot.slane %v3243_v27, %v3257_v47  ;;  %v841_v62 = vrot.slane %v3247_v38, %v3257_v47 }
  0xe3   :  { %v848_v27 = vrot.slane %v3247_v38, %v3260_v48  ;;  %v876_v38 = vrot.slane %v3254_v45, %v3260_v48 }
  0xe4   :  { %v3342_v5 = vpop.xlane.xlu1 %245  ;;  %1958 = vperm.xlu1 %2773, %v1849_v40   ;;  %v3344_v7 = vpop.xlane.xlu0 %242 }
  0xe5   :  { %1985 = vperm.xlu0 %2772, %v1858_v1   ;;  %v1857_v1 = vcombine.low %v701_v54, %v708_v58 }
  0xe8   :  { %v3354_v14 = vpop.xlane.xlu1 %251  ;;  %1961 = vperm.xlu1 %2773, %v1850_v19   ;;  %v3356_v25 = vpop.xlane.xlu0 %248  ;;  %v883_v19 = vrot.slane %v3252_v44, %v3257_v47  ;;  %v918_v44 = vrot.slane %v3262_v50, %v3260_v48 }
  0xe9   :  { %1991 = vperm.xlu0 %2772, %v1860_v10   ;;  %v1859_v10 = vcombine.low %v729_v4, %v736_v0 }
  0xea   :  { %v1870_v3 = vcombine.low %v883_v19, %v890_v36  ;;  %v869_v19 = vrot.slane %v3254_v45, %v3257_v47  ;;  %v904_v45 = vrot.slane %v3264_v51, %v3260_v48 }
  0xec   :  { %v3366_v26 = vpop.xlane.xlu1 %257  ;;  %1964 = vperm.xlu1 %2773, %v1851_v16   ;;  %v3368_v34 = vpop.xlane.xlu0 %254  ;;  %v911_v16 = vrot.slane %v3262_v50, %v3257_v47  ;;  %v946_v50 = vrot.slane %v3270_v56, %v3260_v48 }
  0xed   :  { %1997 = vperm.xlu0 %2772, %v1862_v43   ;;  %v1861_v43 = vcombine.low %v757_v13, %v764_v6 }
  0xee   :  { %v1872_v9 = vcombine.low %v911_v16, %v918_v44  ;;  %v897_v16 = vrot.slane %v3264_v51, %v3257_v47  ;;  %v932_v51 = vrot.slane %v3272_v57, %v3260_v48 }
  0xf0   :  { %v3378_v42 = vpop.xlane.xlu1 %263  ;;  %1970 = vperm.xlu1 %2773, %v1853_v29   ;;  %v3380_v31 = vpop.xlane.xlu0 %260  ;;  %v939_v29 = vrot.slane %v3270_v56, %v3257_v47  ;;  %v974_v56 = vrot.slane %v3282_v2, %v3260_v48 }
  0xf1   :  { %2003 = vperm.xlu0 %2772, %v1864_v49   ;;  %v1863_v49 = vcombine.low %v785_v24, %v792_v12 }
  0xf2   :  { %v1874_v15 = vcombine.low %v939_v29, %v946_v50  ;;  %v925_v29 = vrot.slane %v3272_v57, %v3257_v47  ;;  %v960_v57 = vrot.slane %v3284_v28, %v3260_v48 }
  0xf4   :  { %v3390_v63 = vpop.xlane.xlu1 %269  ;;  %1976 = vperm.xlu1 %2773, %v1855_v53   ;;  %v3392_v40 = vpop.xlane.xlu0 %266  ;;  %v967_v53 = vrot.slane %v3282_v2, %v3257_v47  ;;  %v1002_v2 = vrot.slane %v3294_v22, %v3260_v48 }
  0xf5   :  { %2009 = vperm.xlu0 %2772, %v1866_v55   ;;  %v1865_v55 = vcombine.low %v813_v39, %v820_v18 }
  0xf6   :  { %v1876_v23 = vcombine.low %v967_v53, %v974_v56  ;;  %v953_v53 = vrot.slane %v3284_v28, %v3257_v47  ;;  %v988_v28 = vrot.slane %v3296_v11, %v3260_v48 }
  0xf8   :  { %v3402_v8 = vpop.xlane.xlu1 %275  ;;  %1982 = vperm.xlu1 %2773, %v1857_v1   ;;  %v3404_v37 = vpop.xlane.xlu0 %272  ;;  %v995_v1 = vrot.slane %v3294_v22, %v3257_v47  ;;  %v1030_v22 = vrot.slane %v3306_v20, %v3260_v48 }
  0xf9   :  { %2015 = vperm.xlu0 %2772, %v1868_v61   ;;  %v1867_v61 = vcombine.low %v841_v62, %v848_v27 }
  0xfa   :  { %v1878_v36 = vcombine.low %v995_v1, %v1002_v2  ;;  %v981_v1 = vrot.slane %v3296_v11, %v3257_v47  ;;  %v1016_v11 = vrot.slane %v3308_v21, %v3260_v48 }
  0xfc   :  { %v3414_v17 = vpop.xlane.xlu1 %281  ;;  %1988 = vperm.xlu1 %2773, %v1859_v10   ;;  %v3416_v46 = vpop.xlane.xlu0 %278  ;;  %v1023_v10 = vrot.slane %v3306_v20, %v3257_v47  ;;  %v1058_v20 = vrot.slane %v3318_v33, %v3260_v48 }
  0xfd   :  { %2021 = vperm.xlu0 %2772, %v1870_v3   ;;  %v1869_v3 = vcombine.low %v869_v19, %v876_v38 }
  0xfe   :  { %v1880_v44 = vcombine.low %v1023_v10, %v1030_v22  ;;  %v1009_v10 = vrot.slane %v3308_v21, %v3257_v47  ;;  %v1044_v21 = vrot.slane %v3320_v35, %v3260_v48 }
 0x100   :  { %v3426_v30 = vpop.xlane.xlu1 %287  ;;  %1994 = vperm.xlu1 %2773, %v1861_v43   ;;  %v3428_v52 = vpop.xlane.xlu0 %284  ;;  %v1051_v43 = vrot.slane %v3318_v33, %v3257_v47  ;;  %v1086_v33 = vrot.slane %v3330_v59, %v3260_v48 }
 0x101   :  { %2027 = vperm.xlu0 %2772, %v1872_v9   ;;  %v1871_v9 = vcombine.low %v897_v16, %v904_v45 }
 0x102   :  { %v1882_v50 = vcombine.low %v1051_v43, %v1058_v20  ;;  %v1037_v43 = vrot.slane %v3320_v35, %v3257_v47  ;;  %v1072_v35 = vrot.slane %v3332_v60, %v3260_v48 }
 0x104   :  { %v3438_v54 = vpop.xlane.xlu1 %293  ;;  %2000 = vperm.xlu1 %2773, %v1863_v49   ;;  %v3440_v58 = vpop.xlane.xlu0 %290  ;;  %v1079_v49 = vrot.slane %v3330_v59, %v3257_v47  ;;  %v1114_v59 = vrot.slane %v3342_v5, %v3260_v48 }
 0x105   :  { %2033 = vperm.xlu0 %2772, %v1874_v15   ;;  %v1873_v15 = vcombine.low %v925_v29, %v932_v51 }
 0x106   :  { %v1884_v56 = vcombine.low %v1079_v49, %v1086_v33  ;;  %v1065_v49 = vrot.slane %v3332_v60, %v3257_v47  ;;  %v1100_v60 = vrot.slane %v3344_v7, %v3260_v48 }
 0x108   :  { %v3450_v4 = vpop.xlane.xlu1 %299  ;;  %2006 = vperm.xlu1 %2773, %v1865_v55   ;;  %v3452_v0 = vpop.xlane.xlu0 %296  ;;  %v1107_v55 = vrot.slane %v3342_v5, %v3257_v47  ;;  %v1142_v5 = vrot.slane %v3354_v14, %v3260_v48 }
 0x109   :  { %2039 = vperm.xlu0 %2772, %v1876_v23   ;;  %v1875_v23 = vcombine.low %v953_v53, %v960_v57 }
 0x10a   :  { %v1886_v2 = vcombine.low %v1107_v55, %v1114_v59  ;;  %v1093_v55 = vrot.slane %v3344_v7, %v3257_v47  ;;  %v1128_v7 = vrot.slane %v3356_v25, %v3260_v48 }
 0x10c   :  { %v3462_v13 = vpop.xlane.xlu1 %305  ;;  %2012 = vperm.xlu1 %2773, %v1867_v61   ;;  %v3464_v6 = vpop.xlane.xlu0 %302  ;;  %v1135_v61 = vrot.slane %v3354_v14, %v3257_v47  ;;  %v1170_v14 = vrot.slane %v3366_v26, %v3260_v48 }
 0x10d   :  { %2045 = vperm.xlu0 %2772, %v1878_v36   ;;  %v1877_v36 = vcombine.low %v981_v1, %v988_v28 }
 0x10e   :  { %v1888_v22 = vcombine.low %v1135_v61, %v1142_v5  ;;  %v1121_v61 = vrot.slane %v3356_v25, %v3257_v47  ;;  %v1156_v25 = vrot.slane %v3368_v34, %v3260_v48 }
 0x110   :  { %v3474_v24 = vpop.xlane.xlu1 %311  ;;  %2018 = vperm.xlu1 %2773, %v1869_v3   ;;  %v3476_v12 = vpop.xlane.xlu0 %308  ;;  %v1163_v3 = vrot.slane %v3366_v26, %v3257_v47  ;;  %v1198_v26 = vrot.slane %v3378_v42, %v3260_v48 }
 0x111   :  { %2051 = vperm.xlu0 %2772, %v1880_v44   ;;  %v1879_v44 = vcombine.low %v1009_v10, %v1016_v11 }
 0x112   :  { %v1890_v20 = vcombine.low %v1163_v3, %v1170_v14  ;;  %v1149_v3 = vrot.slane %v3368_v34, %v3257_v47  ;;  %v1184_v34 = vrot.slane %v3380_v31, %v3260_v48 }
 0x114   :  { %v3486_v39 = vpop.xlane.xlu1 %317  ;;  %2024 = vperm.xlu1 %2773, %v1871_v9   ;;  %v3488_v18 = vpop.xlane.xlu0 %314  ;;  %v1191_v9 = vrot.slane %v3378_v42, %v3257_v47  ;;  %v1226_v42 = vrot.slane %v3390_v63, %v3260_v48 }
 0x115   :  { %2057 = vperm.xlu0 %2772, %v1882_v50   ;;  %v1881_v50 = vcombine.low %v1037_v43, %v1044_v21 }
 0x116   :  { %v1892_v33 = vcombine.low %v1191_v9, %v1198_v26  ;;  %v1177_v9 = vrot.slane %v3380_v31, %v3257_v47  ;;  %v1212_v31 = vrot.slane %v3392_v40, %v3260_v48 }
 0x118   :  { %v3498_v62 = vpop.xlane.xlu1 %323  ;;  %2030 = vperm.xlu1 %2773, %v1873_v15   ;;  %v3500_v27 = vpop.xlane.xlu0 %320  ;;  %v1219_v15 = vrot.slane %v3390_v63, %v3257_v47  ;;  %v1254_v63 = vrot.slane %v3402_v8, %v3260_v48 }
 0x119   :  { %2063 = vperm.xlu0 %2772, %v1884_v56   ;;  %v1883_v56 = vcombine.low %v1065_v49, %v1072_v35 }
 0x11a   :  { %v1894_v59 = vcombine.low %v1219_v15, %v1226_v42  ;;  %v1205_v15 = vrot.slane %v3392_v40, %v3257_v47  ;;  %v1240_v40 = vrot.slane %v3404_v37, %v3260_v48 }
 0x11c   :  { %v3510_v19 = vpop.xlane.xlu1 %329  ;;  %2036 = vperm.xlu1 %2773, %v1875_v23   ;;  %v3512_v38 = vpop.xlane.xlu0 %326  ;;  %v1247_v23 = vrot.slane %v3402_v8, %v3257_v47  ;;  %v1282_v8 = vrot.slane %v3414_v17, %v3260_v48 }
 0x11d   :  { %2069 = vperm.xlu0 %2772, %v1886_v2   ;;  %v1885_v2 = vcombine.low %v1093_v55, %v1100_v60 }
 0x11e   :  { %v1896_v5 = vcombine.low %v1247_v23, %v1254_v63  ;;  %v1233_v23 = vrot.slane %v3404_v37, %v3257_v47  ;;  %v1268_v37 = vrot.slane %v3416_v46, %v3260_v48 }
 0x120   :  { %v3522_v16 = vpop.xlane.xlu1 %335  ;;  %2042 = vperm.xlu1 %2773, %v1877_v36   ;;  %v3524_v45 = vpop.xlane.xlu0 %332  ;;  %v1275_v36 = vrot.slane %v3414_v17, %v3257_v47  ;;  %v1310_v17 = vrot.slane %v3426_v30, %v3260_v48 }
 0x121   :  { %2075 = vperm.xlu0 %2772, %v1888_v22   ;;  %v1887_v22 = vcombine.low %v1121_v61, %v1128_v7 }
 0x122   :  { %v1898_v14 = vcombine.low %v1275_v36, %v1282_v8  ;;  %v1261_v36 = vrot.slane %v3416_v46, %v3257_v47  ;;  %v1296_v46 = vrot.slane %v3428_v52, %v3260_v48 }
 0x124   :  { %v3534_v29 = vpop.xlane.xlu1 %341  ;;  %2048 = vperm.xlu1 %2773, %v1879_v44   ;;  %v3536_v51 = vpop.xlane.xlu0 %338  ;;  %v1303_v44 = vrot.slane %v3426_v30, %v3257_v47  ;;  %v1338_v30 = vrot.slane %v3438_v54, %v3260_v48 }
 0x125   :  { %2081 = vperm.xlu0 %2772, %v1890_v20   ;;  %v1889_v20 = vcombine.low %v1149_v3, %v1156_v25 }
 0x126   :  { %v1900_v26 = vcombine.low %v1303_v44, %v1310_v17  ;;  %v1289_v44 = vrot.slane %v3428_v52, %v3257_v47  ;;  %v1317_v52 = vrot.slane %v3440_v58, %v3257_v47 }
 0x128   :  { %v3546_v53 = vpop.xlane.xlu1 %347  ;;  %2054 = vperm.xlu1 %2773, %v1881_v50   ;;  %v3548_v57 = vpop.xlane.xlu0 %344  ;;  %v1331_v50 = vrot.slane %v3438_v54, %v3257_v47  ;;  %v1366_v54 = vrot.slane %v3450_v4, %v3260_v48 }
 0x129   :  { %2087 = vperm.xlu0 %2772, %v1892_v33   ;;  %v1891_v33 = vcombine.low %v1177_v9, %v1184_v34 }
 0x12a   :  { %v1902_v42 = vcombine.low %v1331_v50, %v1338_v30  ;;  %v1899_v50 = vcombine.low %v1289_v44, %v1296_v46  ;;  %v1324_v30 = vrot.slane %v3440_v58, %v3260_v48  ;;  %v1352_v58 = vrot.slane %v3452_v0, %v3260_v48 }
 0x12c   :  { %v3558_v1 = vpop.xlane.xlu1 %353  ;;  %2060 = vperm.xlu1 %2773, %v1883_v56   ;;  %v3560_v28 = vpop.xlane.xlu0 %350  ;;  %v1359_v56 = vrot.slane %v3450_v4, %v3257_v47  ;;  %v1394_v4 = vrot.slane %v3462_v13, %v3260_v48 }
 0x12d   :  { %2093 = vperm.xlu0 %2772, %v1894_v59   ;;  %v1893_v59 = vcombine.low %v1205_v15, %v1212_v31  ;;  %v1478_v15 = vrot.slane %v3498_v62, %v3260_v48 }
 0x12e   :  { %v1904_v63 = vcombine.low %v1359_v56, %v1366_v54  ;;  %v1345_v56 = vrot.slane %v3452_v0, %v3257_v47 }
 0x130   :  { %v3570_v10 = vpop.xlane.xlu1 %359  ;;  %2066 = vperm.xlu1 %2773, %v1885_v2   ;;  %v3572_v11 = vpop.xlane.xlu0 %356  ;;  %v1387_v2 = vrot.slane %v3462_v13, %v3257_v47  ;;  %v1422_v13 = vrot.slane %v3474_v24, %v3260_v48 }
 0x131   :  { %2099 = vperm.xlu0 %2772, %v1896_v5   ;;  %v1895_v5 = vcombine.low %v1233_v23, %v1240_v40  ;;  %v1506_v40 = vrot.slane %v3510_v19, %v3260_v48 }
 0x132   :  { %v1906_v8 = vcombine.low %v1387_v2, %v1394_v4 }
 0x134   :  { %v3582_v43 = vpop.xlane.xlu1 %365  ;;  %2072 = vperm.xlu1 %2773, %v1887_v22   ;;  %v3584_v21 = vpop.xlane.xlu0 %362  ;;  %v1415_v22 = vrot.slane %v3474_v24, %v3257_v47  ;;  %v1450_v24 = vrot.slane %v3486_v39, %v3260_v48 }
 0x135   :  { %2105 = vperm.xlu0 %2772, %v1898_v14   ;;  %v1897_v14 = vcombine.low %v1261_v36, %v1268_v37  ;;  %v1373_v36 = vrot.slane %v3464_v6, %v3257_v47  ;;  %v1380_v37 = vrot.slane %v3464_v6, %v3260_v48 }
 0x136   :  { %v1908_v17 = vcombine.low %v1415_v22, %v1422_v13  ;;  %v1527_v22 = vrot.slane %v3522_v16, %v3257_v47  ;;  %v1534_v13 = vrot.slane %v3522_v16, %v3260_v48  ;;  %v1408_v16 = vrot.slane %v3476_v12, %v3260_v48 }
 0x138   :  { %v3594_v49 = vpop.xlane.xlu1 %371  ;;  %2078 = vperm.xlu1 %2773, %v1889_v20   ;;  %v3596_v35 = vpop.xlane.xlu0 %368  ;;  %v1443_v20 = vrot.slane %v3486_v39, %v3257_v47  ;;  %v1471_v39 = vrot.slane %v3498_v62, %v3257_v47  ;;  %v1499_v62 = vrot.slane %v3510_v19, %v3257_v47 }
 0x139   :  { %2111 = vperm.xlu0 %2772, %v1900_v26   ;;  %v3647_v26 = vand.u32 127, %v502_v32 }
 0x13a   :  { %v1912_v23 = vcombine.low %v1471_v39, %v1478_v15  ;;  %v1562_v39 = vrot.slane %v3534_v29, %v3260_v48 }
 0x13b   :  { %v2233_v32 = vadd.s32 4294967288, %v3647_v26  ;;  %v3676_v0 = vsub.s32 %v3647_v26, %v3250_v41  ;;  %v2247_v4 = vadd.s32 4294967272, %v3647_v26 }
 0x13c   :  { %v3606_v55 = vpop.xlane.xlu1 %377  ;;  %2084 = vperm.xlu1 %2773, %v1891_v33   ;;  %v3608_v60 = vpop.xlane.xlu0 %374  ;;  %v1910_v33 = vcombine.low %v1443_v20, %v1450_v24  ;;  %v2254_v20 = vadd.s32 4294967264, %v3647_v26  ;;  %v1905_v24 = vcombine.low %v1373_v36, %v1380_v37 }
 0x13d   :  { %2117 = vperm.xlu0 %2772, %v1902_v42   ;;  %v1901_v42 = vcombine.low %v1317_v52, %v1324_v30  ;;  %v3672_v2 = vsub.s32 %v2233_v32, %v3250_v41  ;;  %v3693_v6 = vsub.s32 %v2247_v4, %v3250_v41  ;;  %v1916_v30 = vcombine.low %v1527_v22, %v1534_v13 }
 0x13e   :  { %v1590_v4 = vrot.slane %v3546_v53, %v3260_v48  ;;  %v2268_v22 = vadd.s32 4294967248, %v3647_v26 }
 0x140   :  { %v3618_v61 = vpop.xlane.xlu1 %383  ;;  %2090 = vperm.xlu1 %2773, %v1893_v59   ;;  %v3620_v7 = vpop.xlane.xlu0 %380  ;;  %v2240_v59 = vadd.s32 4294967280, %v3647_v26 }
 0x141   :  { %2123 = vperm.xlu0 %2772, %v1904_v63  }
 0x142   :  { %v3684_v19 = vsub.s32 %v2240_v59, %v3250_v41 }
 0x144   :  { %v3630_v3 = vpop.xlane.xlu1 %389  ;;  %2096 = vperm.xlu1 %2773, %v1895_v5   ;;  %v3632_v25 = vpop.xlane.xlu0 %386  ;;  %v1903_v5 = vcombine.low %v1345_v56, %v1352_v58  ;;  %v2261_v58 = vadd.s32 4294967256, %v3647_v26 }
 0x145   :  { %2129 = vperm.xlu0 %2772, %v1906_v8   ;;  %v1914_v8 = vcombine.low %v1499_v62, %v1506_v40 }
 0x148   :  { %v3642_v9 = vpop.xlane.xlu1 %395  ;;  %2102 = vperm.xlu1 %2773, %v1897_v14   ;;  %v3644_v34 = vpop.xlane.xlu0 %392 }
 0x149   :  { %2135 = vperm.xlu0 %2772, %v1908_v17  }
 0x14c   :  { %v3657_v31 = vpop.xlane.xlu1 %401  ;;  %2108 = vperm.xlu1 %2773, %v1899_v50   ;;  %v3664_v54 = vpop.xlane.xlu0 %398  ;;  %v1401_v50 = vrot.slane %v3476_v12, %v3257_v47  ;;  %v3710_v12 = vsub.s32 %v2254_v20, %v3250_v41 }
 0x14d   :  { %2141 = vperm.xlu0 %2772, %v1910_v33   ;;  %v1555_v33 = vrot.slane %v3534_v29, %v3257_v47  ;;  %v1436_v29 = vrot.slane %v3488_v18, %v3260_v48 }
 0x14e   :  { %v1907_v59 = vcombine.low %v1401_v50, %v1408_v16 }
 0x14f   :  { %v1918_v40 = vcombine.low %v1555_v33, %v1562_v39  ;;  %v1485_v33 = vrot.slane %v3512_v38, %v3257_v47 }
 0x150   :  { %v1944_v63 = vpop.permute.xlu1 %1943  ;;  %2114 = vperm.xlu1 %2773, %v1901_v42  }
 0x151   :  { %2147 = vperm.xlu0 %2772, %v1912_v23   ;;  %v2237_v46 = vrot.slane %v1944_v63, %v3672_v2  ;;  %v1429_v23 = vrot.slane %v3488_v18, %v3257_v47  ;;  %v1583_v63 = vrot.slane %v3546_v53, %v3257_v47  ;;  %v3727_v18 = vsub.s32 %v2261_v58, %v3250_v41 }
 0x152   :  { %v1464_v53 = vrot.slane %v3500_v27, %v3260_v48 }
 0x153   :  { %v1909_v13 = vcombine.low %v1429_v23, %v1436_v29 }
 0x154   :  { %v1947_v14 = vpop.permute.xlu1 %1946  ;;  %2120 = vperm.xlu1 %2773, %v1903_v5   ;;  %v1941_v44 = vpop.permute.xlu0 %1940 }
 0x155   :  { %v2232_v17 = vrot.slane %v1941_v44, %v3676_v0  ;;  %2153 = vperm.xlu0 %2772, %v1914_v8   ;;  %v2244_v52 = vrot.slane %v1947_v14, %v3684_v19  ;;  %v1457_v14 = vrot.slane %v3500_v27, %v3257_v47  ;;  %v1920_v44 = vcombine.low %v1583_v63, %v1590_v4 }
 0x156   :  { %v2275_v27 = vadd.s32 4294967240, %v3647_v26  ;;  %v2289_v63 = vadd.s32 4294967224, %v3647_v26 }
 0x157   :  { %v2239_v15 = vsel %vm4127_vm1, %v2237_v46, %v2232_v17  ;;  %v1611_v46 = vrot.slane %v3558_v1, %v3257_v47  ;;  %v1618_v17 = vrot.slane %v3558_v1, %v3260_v48  ;;  %v1492_v1 = vrot.slane %v3512_v38, %v3260_v48 }
 0x158   :  { %v1950_v32 = vpop.permute.xlu1 %1949  ;;  %2126 = vperm.xlu1 %2773, %v1905_v24   ;;  %v3706_v42 = vpop.permute.xlu0 %1967  ;;  %v2246_v62 = vsel %vm2245_vm2, %v2244_v52, %v2239_v15  ;;  %v3743_v52 = vsub.s32 %v2268_v22, %v3250_v41  ;;  %v1639_v15 = vrot.slane %v3570_v10, %v3257_v47  ;;  %v3759_v29 = vsub.s32 %v2275_v27, %v3250_v41 }
 0x159   :  { %v2251_v56 = vrot.slane %v1950_v32, %v3693_v6  ;;  %2159 = vperm.xlu0 %2772, %v1916_v30   ;;  %v1911_v30 = vcombine.low %v1457_v14, %v1464_v53  ;;  %v1922_v39 = vcombine.low %v1611_v46, %v1618_v17  ;;  %v1646_v32 = vrot.slane %v3570_v10, %v3260_v48 }
 0x15a   :  { %v2282_v38 = vadd.s32 4294967232, %v3647_v26  ;;  %v1520_v10 = vrot.slane %v3524_v45, %v3260_v48  ;;  %v2303_v22 = vadd.s32 4294967208, %v3647_v26  ;;  %v1548_v17 = vrot.slane %v3536_v51, %v3260_v48 }
 0x15b   :  { %v2253_v5 = vsel %vm2252_vm3, %v2251_v56, %v2246_v62  ;;  %v1913_v62 = vcombine.low %v1485_v33, %v1492_v1  ;;  %v1924_v4 = vcombine.low %v1639_v15, %v1646_v32  ;;  %v1772_v27 = vrot.slane %v3632_v25, %v3260_v48 }
 0x15c   :  { %v1953_v36 = vpop.permute.xlu1 %1952  ;;  %2132 = vperm.xlu1 %2773, %v1907_v59   ;;  %v3723_v37 = vpop.permute.xlu0 %1973  ;;  %v3777_v53 = vsub.s32 %v2282_v38, %v3250_v41  ;;  %v3793_v33 = vsub.s32 %v2303_v22, %v3250_v41  ;;  %v2317_v1 = vadd.s32 4294967192, %v3647_v26  ;;  %v2324_v22 = vadd.s32 4294967184, %v3647_v26 }
 0x15d   :  { %v2258_v8 = vrot.slane %v1953_v36, %v3710_v12  ;;  %2165 = vperm.xlu0 %2772, %v1918_v40   ;;  %v1513_v40 = vrot.slane %v3524_v45, %v3257_v47  ;;  %v1758_v36 = vrot.slane %v3618_v61, %v3260_v48 }
 0x15f   :  { %v2260_v20 = vsel %vm2259_vm4, %v2258_v8, %v2253_v5  ;;  %v1751_v5 = vrot.slane %v3618_v61, %v3257_v47  ;;  %v1915_v46 = vcombine.low %v1513_v40, %v1520_v10  ;;  %v1541_v61 = vrot.slane %v3536_v51, %v3257_v47 }
 0x160   :  { %v1956_v24 = vpop.permute.xlu1 %1955  ;;  %2138 = vperm.xlu1 %2773, %v1909_v13   ;;  %v3739_v50 = vpop.permute.xlu0 %1979  ;;  %v1786_v40 = vrot.slane %v3630_v3, %v3260_v48 }
 0x161   :  { %v2265_v16 = vrot.slane %v1956_v24, %v3727_v18  ;;  %2171 = vperm.xlu0 %2772, %v1920_v44   ;;  %v2296_v44 = vadd.s32 4294967216, %v3647_v26  ;;  %v1932_v24 = vcombine.low %v1751_v5, %v1758_v36  ;;  %v2331_v5 = vadd.s32 4294967176, %v3647_v26 }
 0x163   :  { %v2267_v56 = vsel %vm2266_vm5, %v2265_v16, %v2260_v20  ;;  %v3785_v20 = vsub.s32 %v2289_v63, %v3250_v41  ;;  %v1765_v16 = vrot.slane %v3632_v25, %v3257_v47  ;;  %v3800_v32 = vsub.s32 %v2296_v44, %v3250_v41 }
 0x164   :  { %v1959_v58 = vpop.permute.xlu1 %1958  ;;  %2144 = vperm.xlu1 %2773, %v1911_v30   ;;  %v3755_v59 = vpop.permute.xlu0 %1985  ;;  %v2310_v25 = vadd.s32 4294967200, %v3647_v26  ;;  %v1604_v44 = vrot.slane %v3560_v28, %v3260_v48 }
 0x165   :  { %v2272_v23 = vrot.slane %v1959_v58, %v3743_v52  ;;  %2177 = vperm.xlu0 %2772, %v1922_v39   ;;  %v1569_v58 = vrot.slane %v3548_v57, %v3257_v47  ;;  %v2293_v38 = vrot.slane %v3706_v42, %v3785_v20  ;;  %v1933_v10 = vcombine.low %v1765_v16, %v1772_v27 }
 0x167   :  { %v2274_v8 = vsel %vm2273_vm6, %v2272_v23, %v2267_v56  ;;  %v1917_v56 = vcombine.low %v1541_v61, %v1548_v17  ;;  %v1576_v23 = vrot.slane %v3548_v57, %v3260_v48  ;;  %v1793_v17 = vrot.slane %v3644_v34, %v3257_v47 }
 0x168   :  { %v1962_v13 = vpop.permute.xlu1 %1961  ;;  %2150 = vperm.xlu1 %2773, %v1913_v62   ;;  %v3773_v14 = vpop.permute.xlu0 %1991  ;;  %v1779_v62 = vrot.slane %v3630_v3, %v3257_v47  ;;  %v3823_v3 = vsub.s32 %v2310_v25, %v3250_v41 }
 0x169   :  { %v2279_v45 = vrot.slane %v1962_v13, %v3759_v29  ;;  %2183 = vperm.xlu0 %2772, %v1924_v4   ;;  %v3815_v4 = vsub.s32 %v2317_v1, %v3250_v41  ;;  %v1919_v13 = vcombine.low %v1569_v58, %v1576_v23  ;;  %v3845_v1 = vsub.s32 %v2324_v22, %v3250_v41 }
 0x16a   :  { %v1934_v61 = vcombine.low %v1779_v62, %v1786_v40  ;;  %v1814_v58 = vrot.slane %v3642_v9, %v3260_v48 }
 0x16b   :  { %v2281_v30 = vsel %vm2280_vm7, %v2279_v45, %v2274_v8  ;;  %v1597_v45 = vrot.slane %v3560_v28, %v3257_v47  ;;  %v3841_v28 = vsub.s32 %v2331_v5, %v3250_v41  ;;  %v2321_v25 = vrot.slane %v3739_v50, %v3815_v4 }
 0x16c   :  { %v1965_v39 = vpop.permute.xlu1 %1964  ;;  %2156 = vperm.xlu1 %2773, %v1915_v46   ;;  %v3796_v51 = vpop.permute.xlu0 %1997  ;;  %v2307_v46 = vrot.slane %v3723_v37, %v3793_v33 }
 0x16d   :  { %v2286_v15 = vrot.slane %v1965_v39, %v3777_v53  ;;  %2207 = vperm.xlu0 %2772, %v1932_v24   ;;  %v1800_v24 = vrot.slane %v3644_v34, %v3260_v48  ;;  %v1921_v34 = vcombine.low %v1597_v45, %v1604_v44  ;;  %v1625_v39 = vrot.slane %v3572_v11, %v3257_v47 }
 0x16e   :  { %v1653_v44 = vrot.slane %v3584_v21, %v3257_v47 }
 0x16f   :  { %v2288_v63 = vsel %vm2287_vm8, %v2286_v15, %v2281_v30  ;;  %v1632_v15 = vrot.slane %v3572_v11, %v3260_v48  ;;  %v1935_v23 = vcombine.low %v1793_v17, %v1800_v24  ;;  %v1842_v17 = vrot.slane %v3657_v31, %v3260_v48 }
 0x170   :  { %v1971_v36 = vpop.permute.xlu1 %1970  ;;  %v2295_v57 = vsel %vm2294_vm9, %v2293_v38, %v2288_v63  ;;  %2162 = vperm.xlu1 %2773, %v1917_v56   ;;  %v3819_v42 = vpop.permute.xlu0 %2003  ;;  %v1807_v56 = vrot.slane %v3642_v9, %v3257_v47  ;;  %v1744_v9 = vrot.slane %v3620_v7, %v3260_v48  ;;  %v2335_v63 = vrot.slane %v3755_v59, %v3841_v28 }
 0x171   :  { %v2300_v8 = vrot.slane %v1971_v36, %v3800_v32  ;;  %2210 = vperm.xlu0 %2772, %v1933_v10   ;;  %v1923_v50 = vcombine.low %v1625_v39, %v1632_v15  ;;  %v1737_v10 = vrot.slane %v3620_v7, %v3257_v47  ;;  %v1821_v36 = vrot.slane %v3664_v54, %v3257_v47 }
 0x172   :  { %v1936_v5 = vcombine.low %v1807_v56, %v1814_v58  ;;  %v2345_v7 = vrot.slane %v3773_v14, %v3672_v2 }
 0x173   :  { %v2302_v16 = vsel %vm2301_vm10, %v2300_v8, %v2295_v57  ;;  %v1828_v57 = vrot.slane %v3664_v54, %v3260_v48  ;;  %v1660_v54 = vrot.slane %v3584_v21, %v3260_v48  ;;  %v1667_v21 = vrot.slane %v3582_v43, %v3257_v47 }
 0x174   :  { %v1977_v26 = vpop.permute.xlu1 %1976  ;;  %v2309_v27 = vsel %vm2308_vm11, %v2307_v46, %v2302_v16  ;;  %2168 = vperm.xlu1 %2773, %v1919_v13   ;;  %v3838_v30 = vpop.permute.xlu0 %2009  ;;  %v1931_v46 = vcombine.low %v1737_v10, %v1744_v9 }
 0x175   :  { %v2314_v37 = vrot.slane %v1977_v26, %v3823_v3  ;;  %2213 = vperm.xlu0 %2772, %v1934_v61   ;;  %v1835_v61 = vrot.slane %v3657_v31, %v3257_v47  ;;  %v1937_v24 = vcombine.low %v1821_v36, %v1828_v57  ;;  %v2355_v31 = vrot.slane %v3796_v51, %v3693_v6 }
 0x176   :  { %v2365_v51 = vrot.slane %v3819_v42, %v3727_v18 }
 0x177   :  { %v2316_v41 = vsel %vm2315_vm12, %v2314_v37, %v2309_v27  ;;  %v1674_v37 = vrot.slane %v3582_v43, %v3260_v48  ;;  %v1938_v39 = vcombine.low %v1835_v61, %v1842_v17  ;;  %v1688_v43 = vrot.slane %v3596_v35, %v3260_v48 }
 0x178   :  { %v1983_v38 = vpop.permute.xlu1 %1982  ;;  %v2323_v62 = vsel %vm4129_vm13, %v2321_v25, %v2316_v41  ;;  %2174 = vperm.xlu1 %2773, %v1921_v34   ;;  %v3859_v40 = vpop.permute.xlu0 %2015  ;;  %v1925_v34 = vcombine.low %v1653_v44, %v1660_v54 }
 0x179   :  { %v2328_v11 = vrot.slane %v1983_v38, %v3845_v1  ;;  %2216 = vperm.xlu0 %2772, %v1935_v23   ;;  %v1926_v41 = vcombine.low %v1667_v21, %v1674_v37  ;;  %v1681_v38 = vrot.slane %v3596_v35, %v3257_v47  ;;  %v2375_v35 = vrot.slane %v3838_v30, %v3759_v29 }
 0x17a   :  { %v1716_v30 = vrot.slane %v3608_v60, %v3260_v48 }
 0x17b   :  { %v2330_v8 = vsel %vm2329_vm14, %v2328_v11, %v2323_v62  ;;  %v1927_v36 = vcombine.low %v1681_v38, %v1688_v43 }
 0x17c   :  { %v3874_v22 = vsel %vm4128_vm15, %v2335_v63, %v2330_v8  ;;  %v1989_v13 = vpop.permute.xlu1 %1988  ;;  %2180 = vperm.xlu1 %2773, %v1923_v50   ;;  %v3876_v45 = vpop.permute.xlu0 %2021  ;;  %v1695_v63 = vrot.slane %v3594_v49, %v3257_v47 }
 0x17d   :  { %v2341_v59 = vrot.slane %v1989_v13, %v3676_v0  ;;  %2219 = vperm.xlu0 %2772, %v1936_v5   ;;  %v1702_v5 = vrot.slane %v3594_v49, %v3260_v48  ;;  %v1709_v49 = vrot.slane %v3608_v60, %v3257_v47 }
 0x17f   :  { %v2346_v16 = vsel %vm4127_vm1, %v2345_v7, %v2341_v59  ;;  %v2384_v7 = vrot.slane %v3859_v40, %v3672_v2  ;;  %v1928_v44 = vcombine.low %v1695_v63, %v1702_v5  ;;  %v1730_v40 = vrot.slane %v3606_v55, %v3260_v48 }
 0x180   :  { %v1995_v14 = vpop.permute.xlu1 %1994  ;;  %2204 = vperm.xlu1 %2773, %v1931_v46   ;;  %v3890_v26 = vpop.permute.xlu0 %2027 }
 0x181   :  { %v2350_v27 = vrot.slane %v1995_v14, %v3684_v19  ;;  %2222 = vperm.xlu0 %2772, %v1937_v24   ;;  %v1723_v24 = vrot.slane %v3606_v55, %v3257_v47  ;;  %v2394_v14 = vrot.slane %v3876_v45, %v3693_v6  ;;  %v2404_v47 = vrot.slane %v3890_v26, %v3727_v18 }
 0x182   :  { %v2801_v45 = vmov 0.0  }
 0x183   :  { %v2351_v15 = vsel %vm2245_vm2, %v2350_v27, %v2346_v16  ;;  %v1929_v16 = vcombine.low %v1709_v49, %v1716_v30 }
 0x184   :  { %v2001_v25 = vpop.permute.xlu1 %2000  ;;  %v2356_v56 = vsel %vm2252_vm3, %v2355_v31, %v2351_v15  ;;  %2186 = vperm.xlu1 %2773, %v1925_v34   ;;  %v2034_v58 = vpop.permute.xlu0 %2033  ;;  %v1930_v31 = vcombine.low %v1723_v24, %v1730_v40 }
 0x185   :  { %v2360_v23 = vrot.slane %v2001_v25, %v3710_v12  ;;  %2225 = vperm.xlu0 %2772, %v1938_v39  }
 0x187   :  { %v2361_v62 = vsel %vm2259_vm4, %v2360_v23, %v2356_v56  ;;  %v2414_v23 = vrot.slane %v2034_v58, %v3759_v29 }
 0x188   :  { %v2007_v11 = vpop.permute.xlu1 %2006  ;;  %v2366_v50 = vsel %vm2266_vm5, %v2365_v51, %v2361_v62  ;;  %2189 = vperm.xlu1 %2773, %v1926_v41   ;;  %v2040_v10 = vpop.permute.xlu0 %2039 }
 0x189   :  { %v2370_v9 = vrot.slane %v2007_v11, %v3743_v52  ;;  %v2424_v62 = vrot.slane %v2040_v10, %v3785_v20 }
 0x18b   :  { %v2371_v42 = vsel %vm2273_vm6, %v2370_v9, %v2366_v50 }
 0x18c   :  { %v3919_v57 = vsel %vm2280_vm7, %v2375_v35, %v2371_v42  ;;  %v2013_v8 = vpop.permute.xlu1 %2012  ;;  %2192 = vperm.xlu1 %2773, %v1927_v36   ;;  %v2046_v13 = vpop.permute.xlu0 %2045 }
 0x18d   :  { %v2380_v59 = vrot.slane %v2013_v8, %v3676_v0  ;;  %v2434_v58 = vrot.slane %v2046_v13, %v3793_v33 }
 0x18f   :  { %v2385_v54 = vsel %vm4127_vm1, %v2384_v7, %v2380_v59  ;;  %vm14_vm1 = vcmask 523268  }
 0x190   :  { %v2019_v46 = vpop.permute.xlu1 %2018  ;;  %2195 = vperm.xlu1 %2773, %v1928_v44   ;;  %v2052_v61 = vpop.permute.xlu0 %2051  ;;  %vm3941_vm15 = vmor %vm14_vm1, %vm13_vm0  ;;  %vm2731_vm1 = vcmask 1041409   ;;  %vm4132_vm0 = vcmask 1048512  }
 0x191   :  { %v2389_v17 = vrot.slane %v2019_v46, %v3684_v19  ;;  %16 = vst.msk [vmem:[#allocation2] sm:$0xff] %vm3941_vm15, %v2801_v45  ;;  %v2444_v10 = vrot.slane %v2052_v61, %v3815_v4 }
 0x193   :  { %v2390_v27 = vsel %vm2245_vm2, %v2389_v17, %v2385_v54 }
 0x194   :  { %v2025_v60 = vpop.permute.xlu1 %2024  ;;  %v2395_v21 = vsel %vm2252_vm3, %v2394_v14, %v2390_v27  ;;  %2198 = vperm.xlu1 %2773, %v1929_v16   ;;  %v2058_v37 = vpop.permute.xlu0 %2057 }
 0x195   :  { %v2399_v34 = vrot.slane %v2025_v60, %v3710_v12  ;;  %v2454_v13 = vrot.slane %v2058_v37, %v3841_v28 }
 0x197   :  { %v2400_v55 = vsel %vm2259_vm4, %v2399_v34, %v2395_v21 }
 0x198   :  { %v2031_v39 = vpop.permute.xlu1 %2030  ;;  %v2405_v15 = vsel %vm2266_vm5, %v2404_v47, %v2400_v55  ;;  %2201 = vperm.xlu1 %2773, %v1930_v31   ;;  %v2064_v25 = vpop.permute.xlu0 %2063 }
 0x199   :  { %v2409_v56 = vrot.slane %v2031_v39, %v3743_v52  ;;  %v2463_v16 = vrot.slane %v2064_v25, %v3672_v2 }
 0x19b   :  { %v2410_v26 = vsel %vm2273_vm6, %v2409_v56, %v2405_v15 }
 0x19c   :  { %v2037_v41 = vpop.permute.xlu1 %2036  ;;  %v2415_v38 = vsel %vm2280_vm7, %v2414_v23, %v2410_v26  ;;  %v2070_v43 = vpop.permute.xlu0 %2069 }
 0x19d   :  { %v2419_v51 = vrot.slane %v2037_v41, %v3777_v53  ;;  %v2473_v34 = vrot.slane %v2070_v43, %v3693_v6 }
 0x19f   :  { %v2420_v11 = vsel %vm2287_vm8, %v2419_v51, %v2415_v38 }
 0x1a0   :  { %v2043_v50 = vpop.permute.xlu1 %2042  ;;  %v2425_v9 = vsel %vm2294_vm9, %v2424_v62, %v2420_v11  ;;  %v2076_v63 = vpop.permute.xlu0 %2075 }
 0x1a1   :  { %v2429_v5 = vrot.slane %v2043_v50, %v3800_v32 }
 0x1a3   :  { %v2430_v36 = vsel %vm2301_vm10, %v2429_v5, %v2425_v9 }
 0x1a4   :  { %v2049_v35 = vpop.permute.xlu1 %2048  ;;  %v2435_v42 = vsel %vm2308_vm11, %v2434_v58, %v2430_v36  ;;  %v2082_v8 = vpop.permute.xlu0 %2081 }
 0x1a5   :  { %v2439_v7 = vrot.slane %v2049_v35, %v3823_v3  ;;  %v2493_v41 = vrot.slane %v2082_v8, %v3759_v29 }
 0x1a7   :  { %v2440_v59 = vsel %vm2315_vm12, %v2439_v7, %v2435_v42 }
 0x1a8   :  { %v2055_v44 = vpop.permute.xlu1 %2054  ;;  %v2445_v49 = vsel %vm4129_vm13, %v2444_v10, %v2440_v59  ;;  %v2088_v30 = vpop.permute.xlu0 %2087  ;;  %vm4133_vm13 = vcmask 130112  }
 0x1a9   :  { %v2449_v54 = vrot.slane %v2055_v44, %v3845_v1  ;;  %v2502_v11 = vrot.slane %v2088_v30, %v3672_v2 }
 0x1ab   :  { %v2450_v46 = vsel %vm2329_vm14, %v2449_v54, %v2445_v49 }
 0x1ac   :  { %v2455_v17 = vsel %vm4132_vm0, %v2454_v13, %v2450_v46  ;;  %v2061_v24 = vpop.permute.xlu1 %2060  ;;  %v2094_v40 = vpop.permute.xlu0 %2093  ;;  %vm2733_vm0 = vcmask 1042434  }
 0x1ad   :  { %v3972_v61 = vsel %vm2731_vm1, %v2455_v17, %v3874_v22  ;;  %v2459_v14 = vrot.slane %v2061_v24, %v3676_v0  ;;  %v2483_v22 = vrot.slane %v2076_v63, %v3727_v18  ;;  %v2512_v35 = vrot.slane %v2094_v40, %v3693_v6 }
 0x1af   :  { %v2464_v27 = vsel %vm4133_vm13, %v2463_v16, %v2459_v14 }
 0x1b0   :  { %v2067_v60 = vpop.permute.xlu1 %2066  ;;  %v2100_v21 = vpop.permute.xlu0 %2099 }
 0x1b1   :  { %v2468_v37 = vrot.slane %v2067_v60, %v3684_v19 }
 0x1b3   :  { %v2469_v31 = vsel %vm2245_vm2, %v2468_v37, %v2464_v27 }
 0x1b4   :  { %v2073_v47 = vpop.permute.xlu1 %2072  ;;  %v2474_v55 = vsel %vm2252_vm3, %v2473_v34, %v2469_v31  ;;  %v2106_v45 = vpop.permute.xlu0 %2105 }
 0x1b5   :  { %v2478_v39 = vrot.slane %v2073_v47, %v3710_v12  ;;  %v2532_v46 = vrot.slane %v2106_v45, %v3759_v29 }
 0x1b7   :  { %v2479_v15 = vsel %vm2259_vm4, %v2478_v39, %v2474_v55 }
 0x1b8   :  { %v2079_v25 = vpop.permute.xlu1 %2078  ;;  %v2484_v56 = vsel %vm2266_vm5, %v2483_v22, %v2479_v15  ;;  %v2112_v23 = vpop.permute.xlu0 %2111 }
 0x1b9   :  { %v2488_v26 = vrot.slane %v2079_v25, %v3743_v52  ;;  %v2542_v27 = vrot.slane %v2112_v23, %v3785_v20 }
 0x1bb   :  { %v2489_v38 = vsel %vm2273_vm6, %v2488_v26, %v2484_v56 }
 0x1bc   :  { %v2494_v43 = vsel %vm2280_vm7, %v2493_v41, %v2489_v38  ;;  %v2085_v51 = vpop.permute.xlu1 %2084  ;;  %v2118_v62 = vpop.permute.xlu0 %2117 }
 0x1bd   :  { %v3991_v50 = vsel %vm2731_vm1, %v2494_v43, %v3919_v57  ;;  %v2498_v9 = vrot.slane %v2085_v51, %v3676_v0  ;;  %v2522_v57 = vrot.slane %v2100_v21, %v3727_v18  ;;  %v2552_v47 = vrot.slane %v2118_v62, %v3793_v33 }
 0x1be   :  { %vm4134_vm1 = vcmask 917312  }
 0x1bf   :  { %v2503_v63 = vsel %vm4133_vm13, %v2502_v11, %v2498_v9  ;;  %vm4135_vm13 = vcmask 1048512  }
 0x1c0   :  { %v2091_v5 = vpop.permute.xlu1 %2090  ;;  %v2124_v58 = vpop.permute.xlu0 %2123 }
 0x1c1   :  { %v2507_v36 = vrot.slane %v2091_v5, %v3684_v19  ;;  %v2562_v25 = vrot.slane %v2124_v58, %v3815_v4 }
 0x1c3   :  { %v2508_v42 = vsel %vm2245_vm2, %v2507_v36, %v2503_v63 }
 0x1c4   :  { %v2097_v8 = vpop.permute.xlu1 %2096  ;;  %v2513_v7 = vsel %vm2252_vm3, %v2512_v35, %v2508_v42  ;;  %v2130_v10 = vpop.permute.xlu0 %2129 }
 0x1c5   :  { %v2517_v59 = vrot.slane %v2097_v8, %v3710_v12  ;;  %v2572_v43 = vrot.slane %v2130_v10, %v3841_v28 }
 0x1c7   :  { %v2518_v44 = vsel %vm2259_vm4, %v2517_v59, %v2513_v7 }
 0x1c8   :  { %v2103_v49 = vpop.permute.xlu1 %2102  ;;  %v2523_v30 = vsel %vm2266_vm5, %v2522_v57, %v2518_v44  ;;  %v4003_v54 = vpop.permute.xlu0 %2135 }
 0x1c9   :  { %v2527_v13 = vrot.slane %v2103_v49, %v3743_v52 }
 0x1cb   :  { %v2528_v17 = vsel %vm2273_vm6, %v2527_v13, %v2523_v30 }
 0x1cc   :  { %v2109_v24 = vpop.permute.xlu1 %2108  ;;  %v2533_v40 = vsel %vm2280_vm7, %v2532_v46, %v2528_v17  ;;  %v4009_v16 = vpop.permute.xlu0 %2141 }
 0x1cd   :  { %v2537_v14 = vrot.slane %v2109_v24, %v3777_v53 }
 0x1cf   :  { %v2538_v60 = vsel %vm2287_vm8, %v2537_v14, %v2533_v40 }
 0x1d0   :  { %v2115_v21 = vpop.permute.xlu1 %2114  ;;  %v2543_v37 = vsel %vm2294_vm9, %v2542_v27, %v2538_v60  ;;  %v4015_v34 = vpop.permute.xlu0 %2147 }
 0x1d1   :  { %v2547_v31 = vrot.slane %v2115_v21, %v3800_v32 }
 0x1d3   :  { %v2548_v55 = vsel %vm2301_vm10, %v2547_v31, %v2543_v37 }
 0x1d4   :  { %v2121_v45 = vpop.permute.xlu1 %2120  ;;  %v2553_v39 = vsel %vm2308_vm11, %v2552_v47, %v2548_v55  ;;  %v4021_v22 = vpop.permute.xlu0 %2153 }
 0x1d5   :  { %v2557_v15 = vrot.slane %v2121_v45, %v3823_v3 }
 0x1d7   :  { %v2558_v56 = vsel %vm2315_vm12, %v2557_v15, %v2553_v39 }
 0x1d8   :  { %v2127_v23 = vpop.permute.xlu1 %2126  ;;  %v2563_v26 = vsel %vm4134_vm1, %v2562_v25, %v2558_v56  ;;  %v2160_v41 = vpop.permute.xlu0 %2159  ;;  %vm4136_vm1 = vcmask 130112  }
 0x1d9   :  { %v2567_v38 = vrot.slane %v2127_v23, %v3845_v1  ;;  %v2620_v40 = vrot.slane %v2160_v41, %v3672_v2 }
 0x1db   :  { %v2568_v51 = vsel %vm2329_vm14, %v2567_v38, %v2563_v26  ;;  %v2581_v26 = vrot.slane %v4003_v54, %v3672_v2  ;;  %v2591_v54 = vrot.slane %v4009_v16, %v3693_v6 }
 0x1dc   :  { %v2573_v62 = vsel %vm4135_vm13, %v2572_v43, %v2568_v51  ;;  %v2133_v11 = vpop.permute.xlu1 %2132  ;;  %v2166_v9 = vpop.permute.xlu0 %2165  ;;  %vm4137_vm13 = vmmov %vm4136_vm1 }
 0x1dd   :  { %v4033_v63 = vsel %vm2733_vm0, %v2573_v62, %v3972_v61  ;;  %v2630_v47 = vrot.slane %v2166_v9, %v3693_v6  ;;  %v2577_v45 = vrot.slane %v2133_v11, %v3676_v0 }
 0x1df   :  { %v2582_v62 = vsel %vm4136_vm1, %v2581_v26, %v2577_v45 }
 0x1e0   :  { %v2139_v5 = vpop.permute.xlu1 %2138  ;;  %v2172_v58 = vpop.permute.xlu0 %2171 }
 0x1e1   :  { %v2586_v56 = vrot.slane %v2139_v5, %v3684_v19  ;;  %v2640_v51 = vrot.slane %v2172_v58, %v3727_v18 }
 0x1e4   :  { %v2145_v36 = vpop.permute.xlu1 %2144  ;;  %v2178_v35 = vpop.permute.xlu0 %2177 }
 0x1e5   :  { %v2596_v9 = vrot.slane %v2145_v36, %v3710_v12 }
 0x1e8   :  { %v4035_v42 = vpop.permute.xlu1 %2150  ;;  %v4037_v8 = vpop.permute.xlu0 %2183 }
 0x1ec   :  { %v2157_v7 = vpop.permute.xlu1 %2156  ;;  %v2208_v10 = vpop.permute.xlu0 %2207 }
 0x1ed   :  { %v2616_v61 = vrot.slane %v2157_v7, %v3676_v0  ;;  %v2699_v21 = vrot.slane %v2208_v10, %v3672_v2 }
 0x1ef   :  { %v2621_v60 = vsel %vm4136_vm1, %v2620_v40, %v2616_v61 }
 0x1f0   :  { %v2163_v59 = vpop.permute.xlu1 %2162  ;;  %v2211_v44 = vpop.permute.xlu0 %2210 }
 0x1f1   :  { %v2625_v17 = vrot.slane %v2163_v59, %v3684_v19  ;;  %v2704_v39 = vrot.slane %v2211_v44, %v3684_v19  ;;  %v2587_v19 = vsel %vm2245_vm2, %v2586_v56, %v2582_v62 }
 0x1f2   :  { %v2592_v44 = vsel %vm2252_vm3, %v2591_v54, %v2587_v19 }
 0x1f3   :  { %v2626_v37 = vsel %vm2245_vm2, %v2625_v17, %v2621_v60 }
 0x1f4   :  { %v2169_v57 = vpop.permute.xlu1 %2168  ;;  %v2214_v30 = vpop.permute.xlu0 %2213  ;;  %v2631_v23 = vsel %vm2252_vm3, %v2630_v47, %v2626_v37 }
 0x1f5   :  { %v2635_v31 = vrot.slane %v2169_v57, %v3710_v12  ;;  %v2650_v57 = vrot.slane %v2178_v35, %v3759_v29 }
 0x1f7   :  { %v2636_v41 = vsel %vm2259_vm4, %v2635_v31, %v2631_v23 }
 0x1f8   :  { %v2175_v49 = vpop.permute.xlu1 %2174  ;;  %v2217_v24 = vpop.permute.xlu0 %2216  ;;  %v2641_v5 = vsel %vm2266_vm5, %v2640_v51, %v2636_v41 }
 0x1f9   :  { %v2645_v38 = vrot.slane %v2175_v49, %v3743_v52  ;;  %v2714_v58 = vrot.slane %v2217_v24, %v3710_v12  ;;  %v2601_v12 = vrot.slane %v4015_v34, %v3727_v18 }
 0x1fb   :  { %v2646_v7 = vsel %vm2273_vm6, %v2645_v38, %v2641_v5 }
 0x1fc   :  { %v2181_v13 = vpop.permute.xlu1 %2180  ;;  %v2220_v15 = vpop.permute.xlu0 %2219 }
 0x1fd   :  { %v2655_v10 = vrot.slane %v2181_v13, %v3777_v53  ;;  %v2719_v16 = vrot.slane %v2220_v15, %v3727_v18  ;;  %v2660_v13 = vrot.slane %v4037_v8, %v3785_v20  ;;  %v2611_v20 = vrot.slane %v4021_v22, %v3759_v29  ;;  %v17_v15 = vld [vmem:[#allocation2] sm:$0xff] }
 0x200   :  { %v2205_v46 = vpop.permute.xlu1 %2204  ;;  %v2223_v59 = vpop.permute.xlu0 %2222 }
 0x201   :  { %v2695_v14 = vrot.slane %v2205_v46, %v3676_v0  ;;  %v2709_v0 = vrot.slane %v2214_v30, %v3693_v6  ;;  %v2597_v30 = vsel %vm2259_vm4, %v2596_v9, %v2592_v44  ;;  %v2606_v46 = vrot.slane %v4035_v42, %v3743_v52 }
 0x202   :  { %v2651_v6 = vsel %vm2280_vm7, %v2650_v57, %v2646_v7  ;;  %v2602_v42 = vsel %vm2266_vm5, %v2601_v12, %v2597_v30  ;;  %v2724_v24 = vrot.slane %v2223_v59, %v3743_v52 }
 0x203   :  { %v2700_v55 = vsel %vm4137_vm13, %v2699_v21, %v2695_v14  ;;  %v2656_v53 = vsel %vm2287_vm8, %v2655_v10, %v2651_v6  ;;  %v2607_v18 = vsel %vm2273_vm6, %v2606_v46, %v2602_v42 }
 0x204   :  { %v2187_v27 = vpop.permute.xlu1 %2186  ;;  %v2705_v43 = vsel %vm2245_vm2, %v2704_v39, %v2700_v55  ;;  %v2226_v40 = vpop.permute.xlu0 %2225  ;;  %v2661_v34 = vsel %vm2294_vm9, %v2660_v13, %v2656_v53  ;;  %v2612_v21 = vsel %vm2280_vm7, %v2611_v20, %v2607_v18  ;;  %vm2735_vm2 = vcmask 1043459  }
 0x205   :  { %v2710_v2 = vsel %vm2252_vm3, %v2709_v0, %v2705_v43  ;;  %v2665_v35 = vrot.slane %v2187_v27, %v3800_v32  ;;  %v2729_v52 = vrot.slane %v2226_v40, %v3759_v29  ;;  %vm4138_vm3 = vcmask 917312  }
 0x206   :  { %v2715_v36 = vsel %vm2259_vm4, %v2714_v58, %v2710_v2  ;;  %vm4139_vm4 = vcmask 1048512  }
 0x207   :  { %v2720_v61 = vsel %vm2266_vm5, %v2719_v16, %v2715_v36 }
 0x208   :  { %v2190_v25 = vpop.permute.xlu1 %2189  ;;  %v2725_v8 = vsel %vm2273_vm6, %v2724_v24, %v2720_v61 }
 0x209   :  { %v2670_v17 = vrot.slane %v2190_v25, %v3793_v33  ;;  %v2666_v33 = vsel %vm2301_vm10, %v2665_v35, %v2661_v34 }
 0x20c   :  { %v2193_v11 = vpop.permute.xlu1 %2192 }
 0x20d   :  { %v2675_v14 = vrot.slane %v2193_v11, %v3823_v3  ;;  %v2671_v3 = vsel %vm2308_vm11, %v2670_v17, %v2666_v33 }
 0x20f   :  { %v2676_v37 = vsel %vm2315_vm12, %v2675_v14, %v2671_v3 }
 0x210   :  { %v2196_v49 = vpop.permute.xlu1 %2195 }
 0x211   :  { %v2680_v32 = vrot.slane %v2196_v49, %v3815_v4  ;;  %v2730_v4 = vsel %vm2280_vm7, %v2729_v52, %v2725_v8 }
 0x213   :  { %v2681_v22 = vsel %vm4138_vm3, %v2680_v32, %v2676_v37 }
 0x214   :  { %v2199_v60 = vpop.permute.xlu1 %2198 }
 0x215   :  { %v2685_v27 = vrot.slane %v2199_v60, %v3845_v1  ;;  %v2738_v1 = vsel %vm2733_vm0, %v2612_v21, %v3991_v50 }
 0x216   :  { %v2739_v45 = vsel %vm2735_vm2, %v2730_v4, %v2738_v1 }
 0x217   :  { %v2686_v55 = vsel %vm2329_vm14, %v2685_v27, %v2681_v22 }
 0x218   :  { %v2202_v31 = vpop.permute.xlu1 %2201 }
 0x219   :  { %v2690_v47 = vrot.slane %v2202_v31, %v3841_v28 }
 0x21b   :  { %v2691_v29 = vsel %vm4139_vm4, %v2690_v47, %v2686_v55 }
 0x21c   :  { %v2736_v39 = vsel %vm2735_vm2, %v2691_v29, %v4033_v63 }
 0x21d   :  { %v2740_v25 = vcombine.low %v2736_v39, %v2739_v45 }
 0x21f   :  { %v2742_v56 = vadd.f32 %v2740_v25, %v17_v15 }
 0x221   :  { %2746 = vst.msk [vmem:[#allocation2] sm:$0xff] %vm3941_vm15, %v2742_v56 }
 0x228   :  { %v2750_v23 = vld [vmem:[#allocation2] sm:$0xff] }
 0x229   :  { %v2751_v28 = vmul.f32 0.020408163, %v2750_v23 }
 0x22b   :  { %2752 = vst.msk [vmem:[#allocation2] sm:$0xff] %vm3941_vm15, %v2751_v28 }
 0x22c   :  { %2785 = shalt.err (!%p2782_p4)
}
 0x22d   :  { %s2786_s28 = scalar_lea.hbm %s4126_s1, 128 }
 0x22e   :  { %p2787_p5 = scmp.ne.s32.totalorder %s4126_s1, %s2786_s28  ;;  %p2790_p6 = scmp.lt.u32.totalorder %s2786_s28, %s4126_s1 }
 0x230   :  { %p2792_p7 = pnand %p2790_p6, %p2787_p5 }
 0x232   :  { %2795 = shalt.err (!%p2792_p7)
}
 0x233   :  { %2762 = dma.vmem_to_hbm [thread:$0]  %s2760_s24, 128, %s4126_s1, [#allocation3]  }
 0x234   :  { %2796 = dma.done.wait [#allocation3], 128  }
 0x235   :  { %2797 = vsyncadd [#allocation3], 4294967168 }
 0x236   :  { %2766 = vsyncpa [#allocation3], 1 }

</bundles_post_ra>
